<compile_context>
chip_gen: v7x
topology: tpu7x:2x2x1
jax: 0.10.0
libtpu: 0.0.40
codegen_flags: <defaults>
</compile_context>

<pallas_src>
import jax
import jax.numpy as jnp
from jax.experimental import pallas as pl
from jax.experimental.pallas import tpu as pltpu


def pipe_kernel(x_ref, w_ref, b_ref, o_ref):
    """One grid step = one block of rows pushed through all pipeline stages."""
    num_stages = w_ref.shape[0]

    # Load the row block once; carry the inter-stage activation in bf16
    # (lives in a VMEM temporary, not registers).
    h_bf16 = x_ref[...].astype(jnp.bfloat16)
    act = None

    # Pipeline partitions: Linear (MXU, bf16 in / f32 acc) -> bias -> ReLU.
    # num_stages is static, so this unrolls fully at trace time.
    for s in range(num_stages):
        acc = jnp.dot(h_bf16, w_ref[s], preferred_element_type=jnp.float32)
        act = jnp.maximum(acc + b_ref[s], 0.0)      # f32 bias/ReLU epilogue
        h_bf16 = act.astype(jnp.bfloat16)           # bf16 carry to next stage

    # Single lane-dense store of the final (f32) activation for this block.
    o_ref[...] = act.astype(o_ref.dtype)


def _choose_block_rows(batch, split_size, target=256):
    """Rows per grid step: a multiple of the Pipe micro-batch size that
    divides the batch and reaches >= `target` rows when the batch allows."""
    rows = split_size
    while rows < target and batch % (rows * 2) == 0 and rows * 2 <= batch:
        rows *= 2
    return rows


def pipe_forward(x, weights_bf16, biases, *, split_size):
    """Pipe.forward: split into micro-batches, run the pipeline, concatenate.

    `weights_bf16` is the stacked [num_stages, H, H] weight tensor already in
    bf16 (cast once at setup, outside the hot path).  Micro-batches are packed
    into >=256-row blocks per grid step; this is numerically identical to
    running each micro-batch separately.
    """
    batch, hidden = x.shape
    num_stages = weights_bf16.shape[0]
    assert batch % split_size == 0, "mini-batch must divide into micro-batches"
    assert weights_bf16.dtype == jnp.bfloat16

    block_rows = _choose_block_rows(batch, split_size)
    num_blocks = batch // block_rows

    # Compile-time VMEM budget guard for the resident-weight-stack design
    # (2 buffers for the constant-index weight stack + in/out/activation tiles).
    vmem_limit = 32 * 1024 * 1024
    resident_bytes = (2 * weights_bf16.size * 2                    # weight stack x2 bufs
                      + 2 * biases.size * 4
                      + 2 * 2 * block_rows * hidden * 4            # x/out blocks x2 bufs
                      + 3 * block_rows * hidden * 4)               # activation temporaries
    assert resident_bytes < vmem_limit, (
        "resident weight stack too large for VMEM; use the stage-streaming "
        "fallback tiling (see TODO at top of file)")

    cost = pl.CostEstimate(
        flops=2 * batch * hidden * hidden * num_stages,
        transcendentals=0,
        bytes_accessed=(x.size * x.dtype.itemsize
                        + weights_bf16.size * 2
                        + biases.size * biases.dtype.itemsize
                        + batch * hidden * x.dtype.itemsize),
    )

    return pl.pallas_call(
        pipe_kernel,
        out_shape=jax.ShapeDtypeStruct((batch, hidden), x.dtype),
        grid_spec=pltpu.PrefetchScalarGridSpec(
            num_scalar_prefetch=0,
            grid=(num_blocks,),
            in_specs=[
                # packed block of micro-batches (>=256 rows when possible)
                pl.BlockSpec((block_rows, hidden), lambda m: (m, 0)),
                # full weight / bias stacks, constant block index -> DMA'd
                # once and kept resident in VMEM across all row blocks
                pl.BlockSpec((num_stages, hidden, hidden), lambda m: (0, 0, 0)),
                pl.BlockSpec((num_stages, 1, hidden), lambda m: (0, 0, 0)),
            ],
            out_specs=pl.BlockSpec((block_rows, hidden), lambda m: (m, 0)),
        ),
        compiler_params=pltpu.CompilerParams(
            dimension_semantics=("parallel",),   # v7x: blocks split over 2 TCs
            vmem_limit_bytes=vmem_limit,
        ),
        cost_estimate=cost,
    )(x, weights_bf16, biases)


def pipe_reference(x, weights_bf16, biases):
    """Pure-JAX reference matching the kernel's bf16-carry / f32-acc path."""
    h_bf16 = x.astype(jnp.bfloat16)
    act = None
    for s in range(weights_bf16.shape[0]):
        acc = jnp.dot(h_bf16, weights_bf16[s], preferred_element_type=jnp.float32)
        act = jnp.maximum(acc + biases[s, 0], 0.0)
        h_bf16 = act.astype(jnp.bfloat16)
    return act.astype(x.dtype)


if __name__ == "__main__":
    BATCH = 512        # mini-batch rows (2 blocks of 256 -> even v7x split)
    HIDDEN = 256       # feature width (multiple of 128 -> lane-dense)
    NUM_STAGES = 4     # number of pipeline partitions
    SPLIT_SIZE = 128   # Pipe micro-batch size (packed 2-per-block in kernel)

    key = jax.random.PRNGKey(0)
    kx, kw, kb = jax.random.split(key, 3)

    x = jax.random.normal(kx, (BATCH, HIDDEN), dtype=jnp.float32)
    # Deterministic synthetic parameters for the Linear partitions.
    weights_f32 = jax.random.normal(kw, (NUM_STAGES, HIDDEN, HIDDEN),
                                    dtype=jnp.float32) * (1.0 / jnp.sqrt(HIDDEN))
    biases = jax.random.normal(kb, (NUM_STAGES, 1, HIDDEN),
                               dtype=jnp.float32) * 0.1
    # Cast weights to bf16 ONCE at setup (not per forward call).
    weights_bf16 = jax.block_until_ready(weights_f32.astype(jnp.bfloat16))

    out = pipe_forward(x, weights_bf16, biases, split_size=SPLIT_SIZE)
    out = jax.block_until_ready(out)

    ref = pipe_reference(x, weights_bf16, biases)
    assert out.shape == (BATCH, HIDDEN)
    assert jnp.allclose(out, ref, atol=1e-2, rtol=1e-2), "mismatch vs reference"

    # TODO(synk): the worker-thread queues / per-device placement of the
    # PyTorch Pipe have no Pallas equivalent on a single TensorCore; the
    # clock-schedule overlap is realized via Pallas grid software-pipelining
    # (and the "parallel" row-block axis across TensorCores on v7x).
    print("KERNEL_OK")
</pallas_src>

<mosaic_0001>
module attributes {stable_mosaic.version = 11 : i64} {
  func.func @pipe_kernel(%arg0: i32, %arg1: memref<256x256xf32, #tpu.memory_space<vmem>>, %arg2: memref<4x256x256xbf16, #tpu.memory_space<vmem>>, %arg3: memref<4x1x256xf32, #tpu.memory_space<vmem>>, %arg4: memref<256x256xf32, #tpu.memory_space<vmem>>) attributes {dimension_semantics = [#tpu.dimension_semantics<parallel>], iteration_bounds = array<i64: 2>, scalar_prefetch = 0 : i64, scratch_operands = 0 : i64, tpu.core_type = #tpu.core_type<tc>, window_params = [{transform_indices = @transform_0, window_bounds = array<i64: 256, 256>}, {pipeline_mode = #tpu.pipeline_mode<synchronous>, transform_indices = @transform_1, window_bounds = array<i64: 4, 256, 256>}, {pipeline_mode = #tpu.pipeline_mode<synchronous>, transform_indices = @transform_2, window_bounds = array<i64: 4, 1, 256>}, {transform_indices = @transform_3, window_bounds = array<i64: 256, 256>}]} {
    %c0 = arith.constant 0 : index
    %c0_0 = arith.constant 0 : index
    %0 = vector.load %arg1[%c0, %c0_0] : memref<256x256xf32, #tpu.memory_space<vmem>>, vector<256x256xf32>
    %1 = arith.truncf %0 : vector<256x256xf32> to vector<256x256xbf16>
    %c0_1 = arith.constant 0 : index
    %c0_2 = arith.constant 0 : index
    %c0_3 = arith.constant 0 : index
    %2 = vector.load %arg2[%c0_1, %c0_2, %c0_3] : memref<4x256x256xbf16, #tpu.memory_space<vmem>>, vector<1x256x256xbf16>
    %3 = vector.shape_cast %2 : vector<1x256x256xbf16> to vector<256x256xbf16>
    %cst = arith.constant dense<0.000000e+00> : vector<256x256xf32>
    %4 = tpu.matmul %1, %3, %cst {dimension_numbers = #tpu.dot_dimension_numbers<[1], [0], [0], [1], [0, 0, 1, 1], [], []>} : vector<256x256xbf16>, vector<256x256xbf16>, vector<256x256xf32> -> vector<256x256xf32>
    %c0_4 = arith.constant 0 : index
    %c0_5 = arith.constant 0 : index
    %c0_6 = arith.constant 0 : index
    %5 = vector.load %arg3[%c0_4, %c0_5, %c0_6] : memref<4x1x256xf32, #tpu.memory_space<vmem>>, vector<1x1x256xf32>
    %6 = vector.shape_cast %5 : vector<1x1x256xf32> to vector<1x256xf32>
    %7 = vector.broadcast %6 : vector<1x256xf32> to vector<256x256xf32>
    %8 = arith.addf %4, %7 : vector<256x256xf32>
    %cst_7 = arith.constant 0.000000e+00 : f32
    %9 = vector.broadcast %cst_7 : f32 to vector<256x256xf32>
    %10 = arith.maximumf %8, %9 : vector<256x256xf32>
    %11 = arith.truncf %10 : vector<256x256xf32> to vector<256x256xbf16>
    %c1 = arith.constant 1 : index
    %c0_8 = arith.constant 0 : index
    %c0_9 = arith.constant 0 : index
    %12 = vector.load %arg2[%c1, %c0_8, %c0_9] : memref<4x256x256xbf16, #tpu.memory_space<vmem>>, vector<1x256x256xbf16>
    %13 = vector.shape_cast %12 : vector<1x256x256xbf16> to vector<256x256xbf16>
    %cst_10 = arith.constant dense<0.000000e+00> : vector<256x256xf32>
    %14 = tpu.matmul %11, %13, %cst_10 {dimension_numbers = #tpu.dot_dimension_numbers<[1], [0], [0], [1], [0, 0, 1, 1], [], []>} : vector<256x256xbf16>, vector<256x256xbf16>, vector<256x256xf32> -> vector<256x256xf32>
    %c1_11 = arith.constant 1 : index
    %c0_12 = arith.constant 0 : index
    %c0_13 = arith.constant 0 : index
    %15 = vector.load %arg3[%c1_11, %c0_12, %c0_13] : memref<4x1x256xf32, #tpu.memory_space<vmem>>, vector<1x1x256xf32>
    %16 = vector.shape_cast %15 : vector<1x1x256xf32> to vector<1x256xf32>
    %17 = vector.broadcast %16 : vector<1x256xf32> to vector<256x256xf32>
    %18 = arith.addf %14, %17 : vector<256x256xf32>
    %cst_14 = arith.constant 0.000000e+00 : f32
    %19 = vector.broadcast %cst_14 : f32 to vector<256x256xf32>
    %20 = arith.maximumf %18, %19 : vector<256x256xf32>
    %21 = arith.truncf %20 : vector<256x256xf32> to vector<256x256xbf16>
    %c2 = arith.constant 2 : index
    %c0_15 = arith.constant 0 : index
    %c0_16 = arith.constant 0 : index
    %22 = vector.load %arg2[%c2, %c0_15, %c0_16] : memref<4x256x256xbf16, #tpu.memory_space<vmem>>, vector<1x256x256xbf16>
    %23 = vector.shape_cast %22 : vector<1x256x256xbf16> to vector<256x256xbf16>
    %cst_17 = arith.constant dense<0.000000e+00> : vector<256x256xf32>
    %24 = tpu.matmul %21, %23, %cst_17 {dimension_numbers = #tpu.dot_dimension_numbers<[1], [0], [0], [1], [0, 0, 1, 1], [], []>} : vector<256x256xbf16>, vector<256x256xbf16>, vector<256x256xf32> -> vector<256x256xf32>
    %c2_18 = arith.constant 2 : index
    %c0_19 = arith.constant 0 : index
    %c0_20 = arith.constant 0 : index
    %25 = vector.load %arg3[%c2_18, %c0_19, %c0_20] : memref<4x1x256xf32, #tpu.memory_space<vmem>>, vector<1x1x256xf32>
    %26 = vector.shape_cast %25 : vector<1x1x256xf32> to vector<1x256xf32>
    %27 = vector.broadcast %26 : vector<1x256xf32> to vector<256x256xf32>
    %28 = arith.addf %24, %27 : vector<256x256xf32>
    %cst_21 = arith.constant 0.000000e+00 : f32
    %29 = vector.broadcast %cst_21 : f32 to vector<256x256xf32>
    %30 = arith.maximumf %28, %29 : vector<256x256xf32>
    %31 = arith.truncf %30 : vector<256x256xf32> to vector<256x256xbf16>
    %c3 = arith.constant 3 : index
    %c0_22 = arith.constant 0 : index
    %c0_23 = arith.constant 0 : index
    %32 = vector.load %arg2[%c3, %c0_22, %c0_23] : memref<4x256x256xbf16, #tpu.memory_space<vmem>>, vector<1x256x256xbf16>
    %33 = vector.shape_cast %32 : vector<1x256x256xbf16> to vector<256x256xbf16>
    %cst_24 = arith.constant dense<0.000000e+00> : vector<256x256xf32>
    %34 = tpu.matmul %31, %33, %cst_24 {dimension_numbers = #tpu.dot_dimension_numbers<[1], [0], [0], [1], [0, 0, 1, 1], [], []>} : vector<256x256xbf16>, vector<256x256xbf16>, vector<256x256xf32> -> vector<256x256xf32>
    %c3_25 = arith.constant 3 : index
    %c0_26 = arith.constant 0 : index
    %c0_27 = arith.constant 0 : index
    %35 = vector.load %arg3[%c3_25, %c0_26, %c0_27] : memref<4x1x256xf32, #tpu.memory_space<vmem>>, vector<1x1x256xf32>
    %36 = vector.shape_cast %35 : vector<1x1x256xf32> to vector<1x256xf32>
    %37 = vector.broadcast %36 : vector<1x256xf32> to vector<256x256xf32>
    %38 = arith.addf %34, %37 : vector<256x256xf32>
    %cst_28 = arith.constant 0.000000e+00 : f32
    %39 = vector.broadcast %cst_28 : f32 to vector<256x256xf32>
    %40 = arith.maximumf %38, %39 : vector<256x256xf32>
    %c0_29 = arith.constant 0 : index
    %c0_30 = arith.constant 0 : index
    %41 = vector.load %arg4[%c0_29, %c0_30] : memref<256x256xf32, #tpu.memory_space<vmem>>, vector<256x256xf32>
    tpu.vector_store %arg4[%c0_29, %c0_30], %40 {strides = array<i32>} : memref<256x256xf32, #tpu.memory_space<vmem>>, vector<256x256xf32>,
    return
  }
  func.func @transform_0(%arg0: i32) -> (i32, i32) {
    %c0_i32 = arith.constant 0 : i32
    %c0_i32_0 = arith.constant 0 : i32
    return %arg0, %c0_i32 : i32, i32
  }
  func.func @transform_1(%arg0: i32) -> (i32, i32, i32) {
    %c0_i32 = arith.constant 0 : i32
    %c0_i32_0 = arith.constant 0 : i32
    %c0_i32_1 = arith.constant 0 : i32
    %c0_i32_2 = arith.constant 0 : i32
    return %c0_i32, %c0_i32_0, %c0_i32_1 : i32, i32, i32
  }
  func.func @transform_2(%arg0: i32) -> (i32, i32, i32) {
    %c0_i32 = arith.constant 0 : i32
    %c0_i32_0 = arith.constant 0 : i32
    %c0_i32_1 = arith.constant 0 : i32
    %c0_i32_2 = arith.constant 0 : i32
    return %c0_i32, %c0_i32_0, %c0_i32_1 : i32, i32, i32
  }
  func.func @transform_3(%arg0: i32) -> (i32, i32) {
    %c0_i32 = arith.constant 0 : i32
    %c0_i32_0 = arith.constant 0 : i32
    return %arg0, %c0_i32 : i32, i32
  }
}

</mosaic_0001>

<bundles_post_ra>
// kernel: tpu_custom_call.1
= control target key start
LH: loop header
LB: loop body
LE: loop exit
PB: predicated region body
PF: predicated region fallthrough
CT: control target
= control target key end

     0   :  { %8 = vsyncpa [#allocation3], 0  ;;  %s3698_s0 = inlined_call_operand.hbm [shape: f32[512,256], index: 0, kind: input, shape index: {}]   ;;  %s3699_s1 = inlined_call_operand.hbm [shape: bf16[4,256,256], index: 1, kind: input, shape index: {}]   ;;  %s3700_s2 = inlined_call_operand.hbm [shape: f32[4,1,256], index: 2, kind: input, shape index: {}]   ;;  %s3701_s3 = inlined_call_operand.hbm [shape: f32[512,256], index: 3, kind: output, shape index: {}]  }
   0x1   :  { %10 = vsyncpa [#allocation3 + $0x1], 0 }
   0x2   :  { %11 = vsyncpa [#allocation6], 0 }
   0x3   :  { %12 = vsyncpa [#allocation4], 0 }
   0x4   :  { %14 = vsyncpa [#allocation4 + $0x1], 0  ;;  %s3043_s12 = smov 0   ;;  %s3045_s13 = smov 0  }
   0x5   :  { %s3047_s14 = smov 0   ;;  %s3049_s15 = smov 0  }
   0x6 LB: > { %s3064_s16 = sadd.s32 4294967295, %s3009_s15   ;;  %s2434_s17 = sadd.s32 4294967294, %s3009_s15   ;;  %s3009_s15 = sphi %s3049_s15, %s3721_s15   ;;  %s3005_s14 = sphi %s3047_s14, %s3720_s14   ;;  %s3001_s13 = sphi %s3045_s13, %s3719_s13   ;;  %s2997_s12 = sphi %s3043_s12, %s3718_s12  }
   0x7   : > { %p40_p0 = scmp.ne.s32.totalorder %s3001_s13, %s2997_s12  ;;  %p3702_p1 = scmp.eq.s32.totalorder %s3064_s16, 0 }
   0x8   : > { %p112_p3 = scmp.eq.s32.totalorder %s2434_s17, 1  ;;  %p2435_p5 = scmp.ge.s32.totalorder %s3009_s15, 1 }
   0x9   : > { %p3073_p4 = por %p3702_p1, %p40_p0  ;;  %p119_p7 = scmp.lt.s32.totalorder %s3009_s15, 3 }
   0xa   : > { %p3078_p6 = por %p112_p3, %p40_p0  ;;  %s3011_s21 = smov [#allocation5]  }
   0xb   : > { %s3705_s18 = scalar_select %p3073_p4, 1, 0 }
   0xc   : > { %s3706_s19 = scalar_select %p3078_p6, 1, 0 }
   0xd   : > { %p3083_p8 = pnand %p2435_p5, %p119_p7  ;;  %s131_s22 = sshll.u32 %s3011_s21, 4  ;;  %s3087_s22 = int_to_ptr.vmem [resolvable:$true] %s131_s22 }
   0xe   : > { %s3012_s24 = smov [#allocation7]   ;;  %s2853_s28 = scalar_lea.hbm %s3699_s1, 16384 }
   0xf   : > { %p2598_p9 = pneg %p3083_p8  ;;  %s144_s25 = sshll.u32 %s3012_s24, 4  ;;  %s3098_s25 = int_to_ptr.vmem [resolvable:$true] %s144_s25 }
  0x10   : > { %p2854_p12 = scmp.ne.s32.totalorder %s3699_s1, %s2853_s28  ;;  %p2860_p5 = scmp.lt.u32.totalorder %s2853_s28, %s3699_s1 }
  0x11   : > { %p3094_p11 = pnand %p2598_p9, %p3702_p1 }
  0x13   : > { %p2855_p13 = pneg %p3094_p11 }
  0x15   : > { %p2856_p0 = pnand %p2855_p13, %p2854_p12 }
  0x17   : > { %p2857_p3 = pneg %p2856_p0 }
  0x19   : > { %p2862_p7 = pnand %p2860_p5, %p2857_p3 }
  0x1b   : > { %2865 = shalt.err (!%p2862_p7)
}
  0x1c   : > { %s2866_s6 = scalar_lea.vmem %s3087_s22, 16384  ;;  %p2874_p2 = scmp.lt.s32.totalorder %s3087_s22, %s3087_s22 }
  0x1d   : > { %p2867_p9 = scmp.ne.s32.totalorder %s3087_s22, %s2866_s6  ;;  %p2875_p12 = scmp.lt.s32.totalorder %s2866_s6, %s2866_s6 }
  0x1f   : > { %p2869_p10 = pnand %p2867_p9, %p2855_p13  ;;  %p2876_p0 = por %p2875_p12, %p2874_p2 }
  0x21   : > { %p2870_p1 = pneg %p2869_p10 }
  0x23   : > { %p2877_p6 = pnand %p2876_p0, %p2870_p1 }
  0x25   : > { %2880 = shalt.err (!%p2877_p6)
}
  0x26   : > { %s3013_s7 = smov 128   ;;  %s3014_s8 = smov 8  }
  0x27   : > { %2601 = dma.hbm_to_vmem [thread:$0]  (!%p3094_p11), %s3699_s1, 16384, %s3087_s22, [#allocation6], %s3013_s7, %s3013_s7, %s3014_s8  }
  0x28   : > { %s2881_s21 = scalar_lea.hbm %s3700_s2, 128 }
  0x29   : > { %p2882_p2 = scmp.ne.s32.totalorder %s3700_s2, %s2881_s21  ;;  %p2888_p10 = scmp.lt.u32.totalorder %s2881_s21, %s3700_s2 }
  0x2b   : > { %p2884_p1 = pnand %p2882_p2, %p2855_p13 }
  0x2d   : > { %p2885_p6 = pneg %p2884_p1 }
  0x2f   : > { %p2890_p3 = pnand %p2888_p10, %p2885_p6 }
  0x31   : > { %2893 = shalt.err (!%p2890_p3)
}
  0x32   : > { %s2894_s22 = scalar_lea.vmem %s3098_s25, 128  ;;  %p2902_p12 = scmp.lt.s32.totalorder %s3098_s25, %s3098_s25 }
  0x33   : > { %p2895_p5 = scmp.ne.s32.totalorder %s3098_s25, %s2894_s22  ;;  %p2903_p0 = scmp.lt.s32.totalorder %s2894_s22, %s2894_s22 }
  0x35   : > { %p2897_p7 = pnand %p2895_p5, %p2855_p13  ;;  %p2904_p2 = por %p2903_p0, %p2902_p12 }
  0x37   : > { %p2898_p9 = pneg %p2897_p7 }
  0x39   : > { %p2905_p1 = pnand %p2904_p2, %p2898_p9 }
  0x3b   : > { %2908 = shalt.err (!%p2905_p1)
}
  0x3c   : > { %s3015_s29 = smov 32   ;;  %s3016_s30 = smov 2  }
  0x3d   : > { %2604 = dma.hbm_to_vmem [thread:$0]  (!%p3094_p11), %s3700_s2, 128, %s3098_s25, [#allocation6], %s3015_s29, %s3015_s29, %s3016_s30  }
  0x3e   : > { %s3153_s6 = sadd.s32 1, %s3009_s15   ;;  %s27_s8 = sadd.s32 1, %s3005_s14 }
  0x3f   : > { %s24_s7 = ssub.s32 %s3009_s15, %s3153_s6  ;;  %p34_p6 = scmp.ne.s32.totalorder %s3005_s14, %s3001_s13 }
  0x40   : > { %p25_p13 = scmp.eq.s32.totalorder %s24_s7, 0  ;;  %p35_p10 = scmp.eq.s32.totalorder %s3009_s15, 0 }
  0x41   : > { %p3709_p5 = scmp.eq.s32.totalorder %s3064_s16, 1  ;;  %p2615_p9 = scmp.lt.s32.totalorder %s3009_s15, 2 }
  0x42   : > { %s3162_s9 = scalar_select %p25_p13, %s3005_s14, %s27_s8  }
  0x43   : > { %p36_p3 = por %p35_p10, %p34_p6  ;;  %p3166_p7 = por %p3709_p5, %p34_p6 }
  0x44   : > { %s158_s23 = sand.u32 1, %s3005_s14   ;;  %s2583_s25 = sshll.u32 %s3009_s15, 13 }
  0x45   : > { %s3710_s10 = scalar_select %p3166_p7, 1, 0 }
  0x46   : > { %s2439_s11 = sshll.u32 %s158_s23, 9  ;;  %s3176_s24 = scalar_lea.hbm %s3698_s0, %s2583_s25 }
  0x47   : > { %s162_s26 = scalar_lea.vmem [#allocation2], %s2439_s11  ;;  %p3180_p11 = pnand %p2615_p9, %p36_p3 }
  0x48   : > { %s170_s27 = sshll.u32 %s162_s26, 4  ;;  %s3184_s22 = scalar_lea.sflag [#allocation3], %s158_s23  ;;  %s3178_s27 = int_to_ptr.vmem [resolvable:$true] %s170_s27 }
  0x49   : > { %s2909_s29 = scalar_lea.hbm %s3176_s24, 8192  ;;  %p2911_p0 = pneg %p3180_p11 }
  0x4a   : > { %p2910_p12 = scmp.ne.s32.totalorder %s3176_s24, %s2909_s29  ;;  %s2914_s5 = scalar_lea.hbm %s3698_s0, 16384 }
  0x4b   : > { %p2915_p13 = scmp.lt.u32.totalorder %s3176_s24, %s3698_s0  ;;  %p2916_p6 = scmp.lt.u32.totalorder %s2914_s5, %s2909_s29 }
  0x4c   : > { %p2912_p2 = pnand %p2911_p0, %p2910_p12  ;;  %p2918_p3 = scmp.lt.u32.totalorder %s2909_s29, %s3176_s24 }
  0x4d   : > { %p2917_p10 = por %p2916_p6, %p2915_p13 }
  0x4e   : > { %p2913_p1 = pneg %p2912_p2 }
  0x4f   : > { %p2919_p5 = por %p2918_p3, %p2917_p10 }
  0x51   : > { %p2920_p9 = pnand %p2919_p5, %p2913_p1 }
  0x53   : > { %2923 = shalt.err (!%p2920_p9)
}
  0x54   : > { %s2924_s23 = scalar_lea.vmem %s3178_s27, 8192  ;;  %s3017_s11 = smov [#allocation2]  }
  0x55   : > { %p2925_p12 = scmp.ne.s32.totalorder %s3178_s27, %s2924_s23  ;;  %s2929_s25 = sshll.u32 %s3017_s11, 4  ;;  %s2930_s25 = int_to_ptr.vmem [resolvable:$false] %s2929_s25 }
  0x56   : > { %s2931_s17 = scalar_lea.vmem %s2930_s25, 16384  ;;  %p2932_p4 = scmp.lt.s32.totalorder %s3178_s27, %s2930_s25 }
  0x57   : > { %p2927_p2 = pnand %p2925_p12, %p2911_p0  ;;  %p2933_p13 = scmp.lt.s32.totalorder %s2931_s17, %s2924_s23 }
  0x59   : > { %p2928_p7 = pneg %p2927_p2  ;;  %p2934_p6 = por %p2933_p13, %p2932_p4 }
  0x5b   : > { %p2935_p10 = pnand %p2934_p6, %p2928_p7 }
  0x5d   : > { %2938 = shalt.err (!%p2935_p10)
}
  0x5e   : > { %s3018_s21 = smov 256   ;;  %s3019_s26 = smov 16  }
  0x5f   : > { %2608 = dma.hbm_to_vmem [thread:$0]  (!%p3180_p11), %s3176_s24, 8192, %s3178_s27, %s3184_s22, %s3018_s21, %s3018_s21, %s3019_s26  }
  0x60   : > { %182 = sbr.rel (%p3083_p8) target bundleno = 1192 (0x4a8), region = 32  ;;  %s3215_s29 = sand.u32 (!%p3083_p8), 1, %s3001_s13  }
  0x61   : > { %s2444_s30 = sshll.u32 (!%p3083_p8), %s3215_s29, 9  ;;  %s185_s4 = scalar_lea.sflag (!%p3083_p8), [#allocation3], %s3215_s29 }
  0x62   : > { %s3221_s5 = scalar_lea.vmem (!%p3083_p8), [#allocation2], %s2444_s30  ;;  %p3712_p4 = scmp.ne.s32.totalorder (!%p3083_p8), %s3705_s18, 0 }
  0x67   : > { %2984 = dma.done.wait (%p3712_p4), %s185_s4, 8192  }
  0x68   : > { %2986 = vsyncadd (%p3712_p4), %s185_s4, 4294959104  ;;  %p3713_p7 = scmp.eq.s32.totalorder %s3064_s16, 0 }
  0x6a   : > { %2988 = dma.done.wait (%p3713_p7), [#allocation6], 16512   ;;  %p3714_p8 = pmov %p3713_p7 }
  0x6b   : > { %v2661_v0 = vld [vmem:[#allocation5 + $0x4] ss:$8 sps:$4 sm:$0xff]   ;;  %v2663_v1 = vld [vmem:[#allocation5] ss:$8 sps:$4 sm:$0xff]   ;;  %v2664_v2 = vld [vmem:[#allocation5 + $0x14] ss:$8 sps:$4 sm:$0xff]  }
  0x6c   : > { %2990 = vsyncadd (%p3714_p8), [#allocation6], 4294950784  ;;  %521 = vmatprep.subr.bf16.mxu0 %v2661_v0  ;;  %v2666_v3 = vld [vmem:[#allocation5 + $0x10] ss:$8 sps:$4 sm:$0xff]   ;;  %v2667_v4 = vld [vmem:[#allocation5 + $0x24] ss:$8 sps:$4 sm:$0xff]  }
  0x6d   : > { %522 = vmatpush1.bf16.msra.mxu0 %v2663_v1  ;;  %v2669_v5 = vld [vmem:[#allocation5 + $0x20] ss:$8 sps:$4 sm:$0xff]   ;;  %v2670_v6 = vld [vmem:[#allocation5 + $0x34] ss:$8 sps:$4 sm:$0xff]   ;;  %v2672_v7 = vld [vmem:[#allocation5 + $0x30] ss:$8 sps:$4 sm:$0xff]  }
  0x6e   : > { %523 = vmatprep.subr.bf16.mxu0 %v2664_v2  ;;  %v2673_v8 = vld [vmem:[#allocation5 + $0x44] ss:$8 sps:$4 sm:$0xff]   ;;  %v2675_v9 = vld [vmem:[#allocation5 + $0x40] ss:$8 sps:$4 sm:$0xff]   ;;  %v2676_v10 = vld [vmem:[#allocation5 + $0x54] ss:$8 sps:$4 sm:$0xff]  }
  0x6f   : > { %v2678_v11 = vld [vmem:[#allocation5 + $0x50] ss:$8 sps:$4 sm:$0xff]   ;;  %v2679_v12 = vld [vmem:[#allocation5 + $0x64] ss:$8 sps:$4 sm:$0xff]   ;;  %v2681_v16 = vld [vmem:[#allocation5 + $0x60] ss:$8 sps:$4 sm:$0xff]  }
  0x70   : > { %v222_v13 = vld [vmem:[%s3221_s5 + $0x8] sm:$0xff]  ;;  %v224_v14 = vld [vmem:[%s3221_s5 + $0x18] sm:$0xff]  ;;  %v221_v38 = vld [vmem:[%s3221_s5] sm:$0xff]  ;;  %s3521_s18 = scalar_lea.vmem [#allocation8], %s2444_s30  ;;  %s2585_s20 = sshll.u32 %s3064_s16, 13 }
  0x71   : > { %524 = vmatpush1.bf16.msra.mxu0 %v2666_v3  ;;  %v286_v15 = vpack.c.bf16 %v224_v14, %v222_v13  ;;  %v2682_v17 = vld [vmem:[#allocation5 + $0x74] ss:$8 sps:$4 sm:$0xff]   ;;  %v2684_v18 = vld [vmem:[#allocation5 + $0x70] ss:$8 sps:$4 sm:$0xff]   ;;  %v2685_v19 = vld [vmem:[#allocation5 + $0x84] ss:$8 sps:$4 sm:$0xff]   ;;  %s3649_s22 = scalar_lea.hbm %s3701_s3, %s2585_s20 }
  0x72   : > { %525 = vmatprep.subr.bf16.mxu0 %v2667_v4  ;;  %v2687_v20 = vld [vmem:[#allocation5 + $0x80] ss:$8 sps:$4 sm:$0xff]   ;;  %v2688_v21 = vld [vmem:[#allocation5 + $0x94] ss:$8 sps:$4 sm:$0xff]   ;;  %v2690_v22 = vld [vmem:[#allocation5 + $0x90] ss:$8 sps:$4 sm:$0xff]  }
  0x73   : > { %553 = vmatprep.mubr.bf16.mxu0 %v286_v15  ;;  %v2691_v23 = vld [vmem:[#allocation5 + $0xa4] ss:$8 sps:$4 sm:$0xff]   ;;  %v2693_v24 = vld [vmem:[#allocation5 + $0xa0] ss:$8 sps:$4 sm:$0xff]   ;;  %v2694_v25 = vld [vmem:[#allocation5 + $0xb4] ss:$8 sps:$4 sm:$0xff]  }
  0x74   : > { %v2696_v26 = vld [vmem:[#allocation5 + $0xb0] ss:$8 sps:$4 sm:$0xff]   ;;  %v2697_v27 = vld [vmem:[#allocation5 + $0xc4] ss:$8 sps:$4 sm:$0xff]   ;;  %v2699_v28 = vld [vmem:[#allocation5 + $0xc0] ss:$8 sps:$4 sm:$0xff]  }
  0x75   : > { %526 = vmatpush1.bf16.msra.mxu0 %v2669_v5  ;;  %v2700_v29 = vld [vmem:[#allocation5 + $0xd4] ss:$8 sps:$4 sm:$0xff]   ;;  %v2702_v30 = vld [vmem:[#allocation5 + $0xd0] ss:$8 sps:$4 sm:$0xff]   ;;  %v2703_v31 = vld [vmem:[#allocation5 + $0xe4] ss:$8 sps:$4 sm:$0xff]  }
  0x76   : > { %527 = vmatprep.subr.bf16.mxu0 %v2670_v6  ;;  %v2705_v32 = vld [vmem:[#allocation5 + $0xe0] ss:$8 sps:$4 sm:$0xff]   ;;  %v2706_v33 = vld [vmem:[#allocation5 + $0xf4] ss:$8 sps:$4 sm:$0xff]   ;;  %v2709_v34 = vld [vmem:[#allocation5 + $0x104] ss:$8 sps:$4 sm:$0xff]  }
  0x77   : > { %v2711_v35 = vld [vmem:[#allocation5 + $0x100] ss:$8 sps:$4 sm:$0xff]   ;;  %v2712_v36 = vld [vmem:[#allocation5 + $0x114] ss:$8 sps:$4 sm:$0xff]   ;;  %v2708_v37 = vld [vmem:[#allocation5 + $0xf0] ss:$8 sps:$4 sm:$0xff]   ;;  %1016 = vmatprep.subr.bf16.mxu1 %v2709_v34 }
  0x78   : > { %v223_v39 = vld [vmem:[%s3221_s5 + $0x10] sm:$0xff]  ;;  %v226_v40 = vld [vmem:[%s3221_s5 + $0x28] sm:$0xff]  ;;  %v228_v41 = vld [vmem:[%s3221_s5 + $0x38] sm:$0xff]  ;;  %1017 = vmatpush1.bf16.msra.mxu1 %v2711_v35  ;;  %s2342_s24 = sshll.u32 %s3521_s18, 4  ;;  %s2328_s16 = scalar_lea.sflag [#allocation4], %s3215_s29  ;;  %s3651_s24 = int_to_ptr.vmem [resolvable:$true] %s2342_s24 }
  0x79   : > { %528 = vmatpush1.bf16.msra.mxu0 %v2672_v7  ;;  %v2714_v42 = vld [vmem:[#allocation5 + $0x110] ss:$8 sps:$4 sm:$0xff]   ;;  %v285_v43 = vpack.c.bf16 %v223_v39, %v221_v38  ;;  %1018 = vmatprep.subr.bf16.mxu1 %v2712_v36  ;;  %v2715_v44 = vld [vmem:[#allocation5 + $0x124] ss:$8 sps:$4 sm:$0xff]   ;;  %v288_v45 = vpack.c.bf16 %v228_v41, %v226_v40  ;;  %v2717_v48 = vld [vmem:[#allocation5 + $0x120] ss:$8 sps:$4 sm:$0xff]  }
  0x7a   : > { %529 = vmatprep.subr.bf16.mxu0 %v2673_v8  ;;  %v225_v46 = vld [vmem:[%s3221_s5 + $0x20] sm:$0xff]  ;;  %v227_v47 = vld [vmem:[%s3221_s5 + $0x30] sm:$0xff]  ;;  %v230_v49 = vld [vmem:[%s3221_s5 + $0x48] sm:$0xff]  ;;  %s2939_s7 = scalar_lea.vmem %s3651_s24, 8192  ;;  %p3715_p0 = scmp.ne.s32.totalorder %s3710_s10, 0 }
  0x7b   : > { %v232_v50 = vld [vmem:[%s3221_s5 + $0x58] sm:$0xff]  ;;  %v2721_v53 = vld [vmem:[#allocation5 + $0x144] ss:$8 sps:$4 sm:$0xff]   ;;  %v287_v54 = vpack.c.bf16 %v227_v47, %v225_v46  ;;  %v2723_v56 = vld [vmem:[#allocation5 + $0x140] ss:$8 sps:$4 sm:$0xff]   ;;  %p2940_p11 = scmp.ne.s32.totalorder %s3651_s24, %s2939_s7  ;;  %s3020_s8 = smov [#allocation8]  }
  0x7c   : > { %1019 = vmatpush1.bf16.msra.mxu1 %v2714_v42  ;;  %v2718_v51 = vld [vmem:[#allocation5 + $0x134] ss:$8 sps:$4 sm:$0xff]   ;;  %v2720_v52 = vld [vmem:[#allocation5 + $0x130] ss:$8 sps:$4 sm:$0xff]   ;;  %v290_v55 = vpack.c.bf16 %v232_v50, %v230_v49  ;;  %v229_v58 = vld [vmem:[%s3221_s5 + $0x40] sm:$0xff]  ;;  %s2943_s23 = sshll.u32 %s3020_s8, 4  ;;  %s2944_s23 = int_to_ptr.vmem [resolvable:$false] %s2943_s23 }
  0x7d   : > { %530 = vmatpush1.bf16.msra.mxu0 %v2675_v9  ;;  %1020 = vmatprep.subr.bf16.mxu1 %v2715_v44  ;;  %v2724_v57 = vld [vmem:[#allocation5 + $0x154] ss:$8 sps:$4 sm:$0xff]   ;;  %v234_v60 = vld [vmem:[%s3221_s5 + $0x68] sm:$0xff]  ;;  %v2726_v62 = vld [vmem:[#allocation5 + $0x150] ss:$8 sps:$4 sm:$0xff]   ;;  %p2941_p1 = pnand %p2940_p11, %p3715_p0  ;;  %s2945_s11 = scalar_lea.vmem %s2944_s23, 16384 }
  0x7e   : > { %531 = vmatprep.subr.bf16.mxu0 %v2676_v10  ;;  %v231_v59 = vld [vmem:[%s3221_s5 + $0x50] sm:$0xff]  ;;  %v236_v61 = vld [vmem:[%s3221_s5 + $0x78] sm:$0xff]  ;;  %v2727_v63 = vld [vmem:[#allocation5 + $0x164] ss:$8 sps:$4 sm:$0xff]   ;;  %p2946_p5 = scmp.lt.s32.totalorder %s3651_s24, %s2944_s23  ;;  %p2947_p9 = scmp.lt.s32.totalorder %s2945_s11, %s2939_s7 }
  0x7f   : > { %v289_v0 = vpack.c.bf16 %v231_v59, %v229_v58  ;;  %v292_v1 = vpack.c.bf16 %v236_v61, %v234_v60  ;;  %v2729_v2 = vld [vmem:[#allocation5 + $0x160] ss:$8 sps:$4 sm:$0xff]   ;;  %v2730_v3 = vld [vmem:[#allocation5 + $0x174] ss:$8 sps:$4 sm:$0xff]   ;;  %v2732_v8 = vld [vmem:[#allocation5 + $0x170] ss:$8 sps:$4 sm:$0xff]   ;;  %p2942_p3 = pneg %p2941_p1 }
  0x80   : > { %1021 = vmatpush1.bf16.msra.mxu1 %v2717_v48  ;;  %v233_v4 = vld [vmem:[%s3221_s5 + $0x60] sm:$0xff]  ;;  %v235_v5 = vld [vmem:[%s3221_s5 + $0x70] sm:$0xff]  ;;  %v238_v6 = vld [vmem:[%s3221_s5 + $0x88] sm:$0xff]  ;;  %p2948_p12 = por %p2947_p9, %p2946_p5 }
  0x81   : > { %532 = vmatpush1.bf16.msra.mxu0 %v2678_v11  ;;  %1022 = vmatprep.subr.bf16.mxu1 %v2718_v51  ;;  %v240_v7 = vld [vmem:[%s3221_s5 + $0x98] sm:$0xff]  ;;  %v291_v9 = vpack.c.bf16 %v235_v5, %v233_v4  ;;  %v2733_v10 = vld [vmem:[#allocation5 + $0x184] ss:$8 sps:$4 sm:$0xff]   ;;  %v239_v15 = vld [vmem:[%s3221_s5 + $0x90] sm:$0xff] }
  0x82   : > { %533 = vmatprep.subr.bf16.mxu0 %v2679_v12  ;;  %v294_v11 = vpack.c.bf16 %v240_v7, %v238_v6  ;;  %v2735_v12 = vld [vmem:[#allocation5 + $0x180] ss:$8 sps:$4 sm:$0xff]   ;;  %v2736_v13 = vld [vmem:[#allocation5 + $0x194] ss:$8 sps:$4 sm:$0xff]   ;;  %v2751_v6 = vld [vmem:[#allocation5 + $0x1e4] ss:$8 sps:$4 sm:$0xff]   ;;  %p2949_p2 = pnand %p2948_p12, %p2942_p3 }
  0x83   : > { %v237_v14 = vld [vmem:[%s3221_s5 + $0x80] sm:$0xff]  ;;  %v247_v35 = vld [vmem:[%s3221_s5 + $0xd0] sm:$0xff]  ;;  %v250_v36 = vld [vmem:[%s3221_s5 + $0xe8] sm:$0xff] }
  0x84   : > { %1023 = vmatpush1.bf16.msra.mxu1 %v2720_v52  ;;  %v245_v34 = vld [vmem:[%s3221_s5 + $0xc0] sm:$0xff]  ;;  %v251_v41 = vld [vmem:[%s3221_s5 + $0xf0] sm:$0xff]  ;;  %v254_v42 = vld [vmem:[%s3221_s5 + $0x108] sm:$0xff] }
  0x85   : > { %534 = vmatpush1.bf16.msra.mxu0 %v2681_v16  ;;  %1024 = vmatprep.subr.bf16.mxu1 %v2721_v53  ;;  %v242_v16 = vld [vmem:[%s3221_s5 + $0xa8] sm:$0xff]  ;;  %v297_v38 = vpack.c.bf16 %v247_v35, %v245_v34  ;;  %v249_v40 = vld [vmem:[%s3221_s5 + $0xe0] sm:$0xff]  ;;  %v255_v47 = vld [vmem:[%s3221_s5 + $0x110] sm:$0xff]  ;;  %v351_v34 = vlaneseq }
  0x86   : > { %535 = vmatprep.subr.bf16.mxu0 %v2682_v17  ;;  %v244_v17 = vld [vmem:[%s3221_s5 + $0xb8] sm:$0xff]  ;;  %v299_v44 = vpack.c.bf16 %v251_v41, %v249_v40  ;;  %v253_v46 = vld [vmem:[%s3221_s5 + $0x100] sm:$0xff]  ;;  %v258_v48 = vld [vmem:[%s3221_s5 + $0x128] sm:$0xff] }
  0x87   : > { %v260_v49 = vld [vmem:[%s3221_s5 + $0x138] sm:$0xff]  ;;  %v301_v50 = vpack.c.bf16 %v255_v47, %v253_v46  ;;  %v257_v52 = vld [vmem:[%s3221_s5 + $0x120] sm:$0xff]  ;;  %v259_v53 = vld [vmem:[%s3221_s5 + $0x130] sm:$0xff] }
  0x88   : > { %1025 = vmatpush1.bf16.msra.mxu1 %v2723_v56  ;;  %v304_v51 = vpack.c.bf16 %v260_v49, %v258_v48  ;;  %v303_v56 = vpack.c.bf16 %v259_v53, %v257_v52  ;;  %v261_v58 = vld [vmem:[%s3221_s5 + $0x140] sm:$0xff]  ;;  %v263_v59 = vld [vmem:[%s3221_s5 + $0x150] sm:$0xff]  ;;  %v266_v60 = vld [vmem:[%s3221_s5 + $0x168] sm:$0xff] }
  0x89   : > { %536 = vmatpush1.bf16.msra.mxu0 %v2684_v18  ;;  %1026 = vmatprep.subr.bf16.mxu1 %v2724_v57  ;;  %v2738_v18 = vld [vmem:[#allocation5 + $0x190] ss:$8 sps:$4 sm:$0xff]   ;;  %v2763_v41 = vld [vmem:[#allocation5 + $0x220] ss:$8 sps:$4 sm:$0xff]   ;;  %v2768_v47 = vld [vmem:[#allocation5 + $0x234] ss:$8 sps:$4 sm:$0xff]  }
  0x8a   : > { %537 = vmatprep.subr.bf16.mxu0 %v2685_v19  ;;  %v293_v19 = vpack.c.bf16 %v239_v15, %v237_v14  ;;  %v268_v61 = vld [vmem:[%s3221_s5 + $0x178] sm:$0xff] }
  0x8b   : > { %v272_v4 = vld [vmem:[%s3221_s5 + $0x198] sm:$0xff] }
  0x8c   : > { %1027 = vmatpush1.bf16.msra.mxu1 %v2726_v62  ;;  %v305_v62 = vpack.c.bf16 %v263_v59, %v261_v58  ;;  %v276_v14 = vld [vmem:[%s3221_s5 + $0x1b8] sm:$0xff] }
  0x8d   : > { %538 = vmatpush1.bf16.msra.mxu0 %v2687_v20  ;;  %1028 = vmatprep.subr.bf16.mxu1 %v2727_v63  ;;  %v2739_v20 = vld [vmem:[#allocation5 + $0x1a4] ss:$8 sps:$4 sm:$0xff]   ;;  %v308_v63 = vpack.c.bf16 %v268_v61, %v266_v60  ;;  %v2760_v35 = vld [vmem:[#allocation5 + $0x210] ss:$8 sps:$4 sm:$0xff]  }
  0x8e   : > { %539 = vmatprep.subr.bf16.mxu0 %v2688_v21  ;;  %v296_v21 = vpack.c.bf16 %v244_v17, %v242_v16  ;;  %v273_v17 = vld [vmem:[%s3221_s5 + $0x1a0] sm:$0xff]  ;;  %v2766_v46 = vld [vmem:[#allocation5 + $0x230] ss:$8 sps:$4 sm:$0xff]  }
  0x90   : > { %1029 = vmatpush1.bf16.msra.mxu1 %v2729_v2  ;;  %v2750_v2 = vld [vmem:[#allocation5 + $0x1d0] ss:$8 sps:$4 sm:$0xff]  }
  0x91   : > { %540 = vmatpush1.bf16.msra.mxu0 %v2690_v22  ;;  %1030 = vmatprep.subr.bf16.mxu1 %v2730_v3  ;;  %v2741_v22 = vld [vmem:[#allocation5 + $0x1a0] ss:$8 sps:$4 sm:$0xff]  }
  0x92   : > { %541 = vmatprep.subr.bf16.mxu0 %v2691_v23  ;;  %v2742_v23 = vld [vmem:[#allocation5 + $0x1b4] ss:$8 sps:$4 sm:$0xff]   ;;  %v270_v3 = vld [vmem:[%s3221_s5 + $0x188] sm:$0xff] }
  0x93   : > { %v310_v7 = vpack.c.bf16 %v272_v4, %v270_v3 }
  0x94   : > { %1031 = vmatpush1.bf16.msra.mxu1 %v2732_v8  ;;  %v2753_v8 = vld [vmem:[#allocation5 + $0x1e0] ss:$8 sps:$4 sm:$0xff]  }
  0x95   : > { %542 = vmatpush1.bf16.msra.mxu0 %v2693_v24  ;;  %1032 = vmatprep.subr.bf16.mxu1 %v2733_v10  ;;  %v241_v24 = vld [vmem:[%s3221_s5 + $0xa0] sm:$0xff] }
  0x96   : > { %543 = vmatprep.subr.bf16.mxu0 %v2694_v25  ;;  %v243_v25 = vld [vmem:[%s3221_s5 + $0xb0] sm:$0xff]  ;;  %v269_v10 = vld [vmem:[%s3221_s5 + $0x180] sm:$0xff] }
  0x98   : > { %1033 = vmatpush1.bf16.msra.mxu1 %v2735_v12  ;;  %v2756_v12 = vld [vmem:[#allocation5 + $0x1f0] ss:$8 sps:$4 sm:$0xff]  }
  0x99   : > { %544 = vmatpush1.bf16.msra.mxu0 %v2696_v26  ;;  %1034 = vmatprep.subr.bf16.mxu1 %v2736_v13  ;;  %v246_v26 = vld [vmem:[%s3221_s5 + $0xc8] sm:$0xff] }
  0x9a   : > { %545 = vmatprep.subr.bf16.mxu0 %v2697_v27  ;;  %v248_v27 = vld [vmem:[%s3221_s5 + $0xd8] sm:$0xff]  ;;  %v274_v13 = vld [vmem:[%s3221_s5 + $0x1a8] sm:$0xff] }
  0x9b   : > { %v312_v16 = vpack.c.bf16 %v276_v14, %v274_v13 }
  0x9c   : > { %1035 = vmatpush1.bf16.msra.mxu1 %v2738_v18  ;;  %v275_v18 = vld [vmem:[%s3221_s5 + $0x1b0] sm:$0xff] }
  0x9d   : > { %546 = vmatpush1.bf16.msra.mxu0 %v2699_v28  ;;  %1036 = vmatprep.subr.bf16.mxu1 %v2739_v20  ;;  %v2744_v28 = vld [vmem:[#allocation5 + $0x1b0] ss:$8 sps:$4 sm:$0xff]  }
  0x9e   : > { %547 = vmatprep.subr.bf16.mxu0 %v2700_v29  ;;  %v295_v29 = vpack.c.bf16 %v243_v25, %v241_v24  ;;  %v280_v20 = vld [vmem:[%s3221_s5 + $0x1d8] sm:$0xff]  ;;  %v279_v24 = vld [vmem:[%s3221_s5 + $0x1d0] sm:$0xff]  ;;  %v282_v25 = vld [vmem:[%s3221_s5 + $0x1e8] sm:$0xff] }
  0xa0   : > { %1037 = vmatpush1.bf16.msra.mxu1 %v2741_v22 }
  0xa1   : > { %548 = vmatpush1.bf16.msra.mxu0 %v2702_v30  ;;  %1038 = vmatprep.subr.bf16.mxu1 %v2742_v23  ;;  %v2745_v30 = vld [vmem:[#allocation5 + $0x1c4] ss:$8 sps:$4 sm:$0xff]  }
  0xa2   : > { %549 = vmatprep.subr.bf16.mxu0 %v2703_v31  ;;  %v298_v31 = vpack.c.bf16 %v248_v27, %v246_v26  ;;  %v277_v23 = vld [vmem:[%s3221_s5 + $0x1c0] sm:$0xff]  ;;  %v284_v26 = vld [vmem:[%s3221_s5 + $0x1f8] sm:$0xff] }
  0xa3   : > { %v313_v27 = vpack.c.bf16 %v279_v24, %v277_v23 }
  0xa4   : > { %1039 = vmatpush1.bf16.msra.mxu1 %v2744_v28  ;;  %v316_v28 = vpack.c.bf16 %v284_v26, %v282_v25 }
  0xa5   : > { %550 = vmatpush1.bf16.msra.mxu0 %v2705_v32  ;;  %v2747_v32 = vld [vmem:[#allocation5 + $0x1c0] ss:$8 sps:$4 sm:$0xff]   ;;  %1040 = vmatprep.subr.bf16.mxu1 %v2745_v30  ;;  %v283_v30 = vld [vmem:[%s3221_s5 + $0x1f0] sm:$0xff] }
  0xa6   : > { %551 = vmatprep.subr.bf16.mxu0 %v2706_v33  ;;  %v2748_v33 = vld [vmem:[#allocation5 + $0x1d4] ss:$8 sps:$4 sm:$0xff]  }
  0xa8   : > { %1041 = vmatpush1.bf16.msra.mxu1 %v2747_v32  ;;  %v2757_v32 = vld [vmem:[#allocation5 + $0x200] ss:$8 sps:$4 sm:$0xff]  }
  0xa9   : > { %552 = vmatpush1.bf16.msra.mxu0 %v2708_v37  ;;  %v252_v37 = vld [vmem:[%s3221_s5 + $0xf8] sm:$0xff]  ;;  %1042 = vmatprep.subr.bf16.mxu1 %v2748_v33  ;;  %v2759_v33 = vld [vmem:[#allocation5 + $0x204] ss:$8 sps:$4 sm:$0xff]  }
  0xaa   : > { %v300_v39 = vpack.c.bf16 %v252_v37, %v250_v36  ;;  %1511 = vmatprep.subr.bf16.mxu0 %v2759_v33  ;;  %v2762_v36 = vld [vmem:[#allocation5 + $0x214] ss:$8 sps:$4 sm:$0xff]   ;;  %v352_v37 = vshrl.u32 %v351_v34, 7 }
  0xac   : > { %554 = vmatmul.mubr.bf16.vlgmr.msra.gmra.mrb[0].mxu0 %v285_v43  ;;  %v256_v43 = vld [vmem:[%s3221_s5 + $0x118] sm:$0xff]  ;;  %1043 = vmatpush1.bf16.msra.mxu1 %v2750_v2  ;;  %v3297_v40 = vsub.s32 1, %v352_v37  ;;  %v2777_v2 = vld [vmem:[#allocation5 + $0x264] ss:$8 sps:$4 sm:$0xff]  }
  0xad   : > { %563 = vmatprep.mubr.bf16.mxu0 %v288_v45  ;;  %v302_v45 = vpack.c.bf16 %v256_v43, %v254_v42  ;;  %1044 = vmatprep.subr.bf16.mxu1 %v2751_v6  ;;  %v2765_v42 = vld [vmem:[#allocation5 + $0x224] ss:$8 sps:$4 sm:$0xff]  }
  0xae   : > { %1512 = vmatpush1.bf16.msra.mxu0 %v2757_v32 }
  0xaf   : > { %1513 = vmatprep.subr.bf16.mxu0 %v2762_v36 }
  0xb0   : > { %1045 = vmatpush1.bf16.msra.mxu1 %v2753_v8 }
  0xb2   : > { %1514 = vmatpush1.bf16.msra.mxu0 %v2760_v35  ;;  %v2784_v35 = vld [vmem:[#allocation5 + $0x290] ss:$8 sps:$4 sm:$0xff]  }
  0xb3   : > { %1515 = vmatprep.subr.bf16.mxu0 %v2765_v42 }
  0xb4   : > { %564 = vmatmul.mubr.bf16.gmra.mrb[4].mxu0 %v287_v54  ;;  %v262_v54 = vld [vmem:[%s3221_s5 + $0x148] sm:$0xff] }
  0xb5   : > { %573 = vmatprep.mubr.bf16.mxu0 %v290_v55  ;;  %v264_v55 = vld [vmem:[%s3221_s5 + $0x158] sm:$0xff] }
  0xb6   : > { %v306_v57 = vpack.c.bf16 %v264_v55, %v262_v54  ;;  %1516 = vmatpush1.bf16.msra.mxu0 %v2763_v41  ;;  %v2769_v54 = vld [vmem:[#allocation5 + $0x240] ss:$8 sps:$4 sm:$0xff]   ;;  %v2771_v55 = vld [vmem:[#allocation5 + $0x244] ss:$8 sps:$4 sm:$0xff]  }
  0xb7   : > { %1517 = vmatprep.subr.bf16.mxu0 %v2768_v47 }
  0xba   : > { %1518 = vmatpush1.bf16.msra.mxu0 %v2766_v46 }
  0xbb   : > { %1519 = vmatprep.subr.bf16.mxu0 %v2771_v55 }
  0xbc   : > { %574 = vmatmul.mubr.bf16.gmra.mrb[8].mxu0 %v289_v0  ;;  %v265_v0 = vld [vmem:[%s3221_s5 + $0x160] sm:$0xff] }
  0xbd   : > { %583 = vmatprep.mubr.bf16.mxu0 %v292_v1  ;;  %v267_v1 = vld [vmem:[%s3221_s5 + $0x170] sm:$0xff] }
  0xbe   : > { %v307_v5 = vpack.c.bf16 %v267_v1, %v265_v0  ;;  %1520 = vmatpush1.bf16.msra.mxu0 %v2769_v54 }
  0xc4   : > { %584 = vmatmul.mubr.bf16.gmra.mrb[12].mxu0 %v291_v9  ;;  %v2754_v9 = vld [vmem:[#allocation5 + $0x1f4] ss:$8 sps:$4 sm:$0xff]  }
  0xc5   : > { %593 = vmatprep.mubr.bf16.mxu0 %v294_v11  ;;  %v271_v11 = vld [vmem:[%s3221_s5 + $0x190] sm:$0xff]  ;;  %1046 = vmatprep.subr.bf16.mxu1 %v2754_v9  ;;  %v2775_v9 = vld [vmem:[#allocation5 + $0x260] ss:$8 sps:$4 sm:$0xff]  }
  0xc6   : > { %1047 = vmatpush1.bf16.msra.mxu1 %v2756_v12  ;;  %v309_v15 = vpack.c.bf16 %v271_v11, %v269_v10  ;;  %v2780_v11 = vld [vmem:[#allocation5 + $0x274] ss:$8 sps:$4 sm:$0xff]  }
  0xcc   : > { %594 = vmatmul.mubr.bf16.gmra.mrb[16].mxu0 %v293_v19  ;;  %v278_v19 = vld [vmem:[%s3221_s5 + $0x1c8] sm:$0xff] }
  0xcd   : > { %603 = vmatprep.mubr.bf16.mxu0 %v296_v21  ;;  %v311_v21 = vpack.c.bf16 %v275_v18, %v273_v17  ;;  %v314_v22 = vpack.c.bf16 %v280_v20, %v278_v19  ;;  %v2778_v17 = vld [vmem:[#allocation5 + $0x270] ss:$8 sps:$4 sm:$0xff]   ;;  %v2783_v20 = vld [vmem:[#allocation5 + $0x284] ss:$8 sps:$4 sm:$0xff]  }
  0xd4   : > { %604 = vmatmul.mubr.bf16.gmra.mrb[20].mxu0 %v295_v29  ;;  %v281_v29 = vld [vmem:[%s3221_s5 + $0x1e0] sm:$0xff] }
  0xd5   : > { %613 = vmatprep.mubr.bf16.mxu0 %v298_v31  ;;  %v315_v31 = vpack.c.bf16 %v283_v30, %v281_v29  ;;  %v2786_v29 = vld [vmem:[#allocation5 + $0x294] ss:$8 sps:$4 sm:$0xff]  }
  0xdc   : > { %614 = vmatmul.mubr.bf16.gmra.mrb[24].mxu0 %v297_v38  ;;  %v3295_v38 = vsub.s32 0, %v352_v37 }
  0xdd   : > { %623 = vmatprep.mubr.bf16.mxu0 %v300_v39  ;;  %v349_v39 = vld [vmem:[#allocation7] sm:$0x3] }
  0xde   : > { %v3300_v43 = vrot.slane %v349_v39, %v3295_v38 }
  0xe4   : > { %624 = vmatmul.mubr.bf16.gmra.mrb[28].mxu0 %v299_v44  ;;  %v3303_v44 = vrot.slane %v349_v39, %v3297_v40  ;;  %v2789_v39 = vld [vmem:[#allocation5 + $0x2a4] ss:$8 sps:$4 sm:$0xff]  }
  0xe5   : > { %633 = vmatprep.mubr.bf16.mxu0 %v302_v45 }
  0xec   : > { %634 = vmatmul.mubr.bf16.gmra.mrb[32].mxu0 %v301_v50 }
  0xed   : > { %643 = vmatprep.mubr.bf16.mxu0 %v304_v51 }
  0xf4   : > { %644 = vmatmul.mubr.bf16.gmra.mrb[36].mxu0 %v303_v56 }
  0xf5   : > { %653 = vmatprep.mubr.bf16.mxu0 %v306_v57  ;;  %v2774_v57 = vld [vmem:[#allocation5 + $0x254] ss:$8 sps:$4 sm:$0xff]  }
  0xf6   : > { %1521 = vmatprep.subr.bf16.mxu0 %v2774_v57  ;;  %v2790_v57 = vld [vmem:[#allocation5 + $0x2b0] ss:$8 sps:$4 sm:$0xff]  }
  0xfc   : > { %654 = vmatmul.mubr.bf16.gmra.mrb[40].mxu0 %v305_v62 }
  0xfd   : > { %663 = vmatprep.mubr.bf16.mxu0 %v308_v63  ;;  %v2772_v63 = vld [vmem:[#allocation5 + $0x250] ss:$8 sps:$4 sm:$0xff]  }
  0xfe   : > { %1522 = vmatpush1.bf16.msra.mxu0 %v2772_v63 }
  0xff   : > { %1523 = vmatprep.subr.bf16.mxu0 %v2777_v2 }
 0x102   : > { %1524 = vmatpush1.bf16.msra.mxu0 %v2775_v9 }
 0x103   : > { %1525 = vmatprep.subr.bf16.mxu0 %v2780_v11  ;;  %v2796_v11 = vld [vmem:[#allocation5 + $0x2d0] ss:$8 sps:$4 sm:$0xff]  }
 0x104   : > { %664 = vmatmul.mubr.bf16.gmra.mrb[44].mxu0 %v307_v5 }
 0x105   : > { %673 = vmatprep.mubr.bf16.mxu0 %v310_v7 }
 0x106   : > { %1526 = vmatpush1.bf16.msra.mxu0 %v2778_v17 }
 0x107   : > { %1527 = vmatprep.subr.bf16.mxu0 %v2783_v20 }
 0x10c   : > { %674 = vmatmul.mubr.bf16.gmra.mrb[48].mxu0 %v309_v15 }
 0x10d   : > { %683 = vmatprep.mubr.bf16.mxu0 %v312_v16 }
 0x114   : > { %684 = vmatmul.mubr.bf16.gmra.mrb[52].mxu0 %v311_v21 }
 0x115   : > { %693 = vmatprep.mubr.bf16.mxu0 %v314_v22 }
 0x11c   : > { %694 = vmatmul.mubr.bf16.gmra.mrb[56].mxu0 %v313_v27  ;;  %v2781_v27 = vld [vmem:[#allocation5 + $0x280] ss:$8 sps:$4 sm:$0xff]  }
 0x11d   : > { %703 = vmatprep.mubr.bf16.mxu0 %v316_v28  ;;  %1528 = vmatpush1.bf16.msra.mxu0 %v2781_v27 }
 0x11e   : > { %1529 = vmatprep.subr.bf16.mxu0 %v2786_v29 }
 0x121   : > { %1530 = vmatpush1.bf16.msra.mxu0 %v2784_v35 }
 0x122   : > { %1531 = vmatprep.subr.bf16.mxu0 %v2789_v39 }
 0x124   : > { %704 = vmatmul.mubr.bf16.gmra.mrb[60].mxu0 %v315_v31 }
 0x17f   : > { %v555_v45 = vpop.f32.mrb[0].mxu0 }
 0x180   : > { %v556_v48 = vadd.f32 %v555_v45, %v3300_v43  ;;  %v557_v49 = vpop.f32.mrb[1].mxu0 }
 0x181   : > { %v558_v50 = vadd.f32 %v557_v49, %v3303_v44  ;;  %v559_v51 = vpop.f32.mrb[2].mxu0  ;;  %v2787_v49 = vld [vmem:[#allocation5 + $0x2a0] ss:$8 sps:$4 sm:$0xff]  }
 0x182   : > { %v560_v52 = vadd.f32 %v559_v51, %v3300_v43  ;;  %v561_v53 = vpop.f32.mrb[3].mxu0  ;;  %v714_v58 = vmax.f32 %v556_v48, 0.0  ;;  %v2792_v51 = vld [vmem:[#allocation5 + $0x2b4] ss:$8 sps:$4 sm:$0xff]   ;;  %1532 = vmatpush1.bf16.msra.mxu0 %v2787_v49 }
 0x183   : > { %v562_v56 = vadd.f32 %v561_v53, %v3303_v44  ;;  %v715_v60 = vmax.f32 %v558_v50, 0.0  ;;  %1533 = vmatprep.subr.bf16.mxu0 %v2792_v51 }
 0x184   : > { %v716_v59 = vmax.f32 %v560_v52, 0.0 }
 0x185   : > { %v717_v61 = vmax.f32 %v562_v56, 0.0 }
 0x186   : > { %v778_v62 = vpack.c.bf16 %v716_v59, %v714_v58  ;;  %1534 = vmatpush1.bf16.msra.mxu0 %v2790_v57 }
 0x187   : > { %v565_v0 = vpop.f32.mrb[4].mxu0  ;;  %v779_v1 = vpack.c.bf16 %v717_v61, %v715_v60  ;;  %v2795_v60 = vld [vmem:[#allocation5 + $0x2c4] ss:$8 sps:$4 sm:$0xff]  }
 0x188   : > { %v566_v3 = vadd.f32 %v565_v0, %v3300_v43  ;;  %v567_v4 = vpop.f32.mrb[5].mxu0  ;;  %1535 = vmatprep.subr.bf16.mxu0 %v2795_v60 }
 0x189   : > { %v568_v5 = vadd.f32 %v567_v4, %v3303_v44  ;;  %v569_v6 = vpop.f32.mrb[6].mxu0  ;;  %1048 = vmatprep.mubr.bf16.mxu1 %v779_v1 }
 0x18a   : > { %v570_v7 = vadd.f32 %v569_v6, %v3300_v43  ;;  %v571_v8 = vpop.f32.mrb[7].mxu0  ;;  %1049 = vmatmul.mubr.bf16.vlgmr.msra.gmra.mrb[0].mxu1 %v778_v62  ;;  %v718_v12 = vmax.f32 %v566_v3, 0.0  ;;  %v2793_v3 = vld [vmem:[#allocation5 + $0x2c0] ss:$8 sps:$4 sm:$0xff]  }
 0x18b   : > { %v572_v10 = vadd.f32 %v571_v8, %v3303_v44  ;;  %v719_v14 = vmax.f32 %v568_v5, 0.0  ;;  %v2798_v5 = vld [vmem:[#allocation5 + $0x2d4] ss:$8 sps:$4 sm:$0xff]   ;;  %1536 = vmatpush1.bf16.msra.mxu0 %v2793_v3 }
 0x18c   : > { %v720_v13 = vmax.f32 %v570_v7, 0.0  ;;  %1537 = vmatprep.subr.bf16.mxu0 %v2798_v5 }
 0x18d   : > { %v721_v15 = vmax.f32 %v572_v10, 0.0 }
 0x18e   : > { %v780_v16 = vpack.c.bf16 %v720_v13, %v718_v12 }
 0x18f   : > { %v781_v18 = vpack.c.bf16 %v721_v15, %v719_v14  ;;  %v575_v19 = vpop.f32.mrb[8].mxu0  ;;  %v2801_v14 = vld [vmem:[#allocation5 + $0x2e4] ss:$8 sps:$4 sm:$0xff]   ;;  %1538 = vmatpush1.bf16.msra.mxu0 %v2796_v11 }
 0x190   : > { %v576_v21 = vadd.f32 %v575_v19, %v3300_v43  ;;  %v577_v22 = vpop.f32.mrb[9].mxu0  ;;  %1539 = vmatprep.subr.bf16.mxu0 %v2801_v14 }
 0x191   : > { %v578_v23 = vadd.f32 %v577_v22, %v3303_v44  ;;  %v579_v24 = vpop.f32.mrb[10].mxu0  ;;  %1058 = vmatprep.mubr.bf16.mxu1 %v781_v18 }
 0x192   : > { %v580_v25 = vadd.f32 %v579_v24, %v3300_v43  ;;  %v581_v26 = vpop.f32.mrb[11].mxu0  ;;  %1059 = vmatmul.mubr.bf16.gmra.mrb[4].mxu1 %v780_v16  ;;  %v722_v30 = vmax.f32 %v576_v21, 0.0  ;;  %v2799_v21 = vld [vmem:[#allocation5 + $0x2e0] ss:$8 sps:$4 sm:$0xff]  }
 0x193   : > { %v582_v28 = vadd.f32 %v581_v26, %v3303_v44  ;;  %v723_v32 = vmax.f32 %v578_v23, 0.0  ;;  %1540 = vmatpush1.bf16.msra.mxu0 %v2799_v21 }
 0x194   : > { %v724_v31 = vmax.f32 %v580_v25, 0.0 }
 0x195   : > { %v725_v33 = vmax.f32 %v582_v28, 0.0 }
 0x196   : > { %v782_v34 = vpack.c.bf16 %v724_v31, %v722_v30 }
 0x197   : > { %v783_v36 = vpack.c.bf16 %v725_v33, %v723_v32  ;;  %v585_v37 = vpop.f32.mrb[12].mxu0 }
 0x198   : > { %v586_v41 = vadd.f32 %v585_v37, %v3300_v43  ;;  %v587_v42 = vpop.f32.mrb[13].mxu0 }
 0x199   : > { %v588_v45 = vadd.f32 %v587_v42, %v3303_v44  ;;  %v589_v46 = vpop.f32.mrb[14].mxu0  ;;  %1068 = vmatprep.mubr.bf16.mxu1 %v783_v36 }
 0x19a   : > { %v590_v47 = vadd.f32 %v589_v46, %v3300_v43  ;;  %v591_v48 = vpop.f32.mrb[15].mxu0  ;;  %1069 = vmatmul.mubr.bf16.gmra.mrb[8].mxu1 %v782_v34  ;;  %v726_v52 = vmax.f32 %v586_v41, 0.0 }
 0x19b   : > { %v592_v50 = vadd.f32 %v591_v48, %v3303_v44  ;;  %v727_v54 = vmax.f32 %v588_v45, 0.0 }
 0x19c   : > { %v728_v53 = vmax.f32 %v590_v47, 0.0 }
 0x19d   : > { %v729_v55 = vmax.f32 %v592_v50, 0.0 }
 0x19e   : > { %v784_v56 = vpack.c.bf16 %v728_v53, %v726_v52 }
 0x19f   : > { %v785_v58 = vpack.c.bf16 %v729_v55, %v727_v54  ;;  %v595_v59 = vpop.f32.mrb[16].mxu0 }
 0x1a0   : > { %v596_v61 = vadd.f32 %v595_v59, %v3300_v43  ;;  %v597_v62 = vpop.f32.mrb[17].mxu0 }
 0x1a1   : > { %v598_v63 = vadd.f32 %v597_v62, %v3303_v44  ;;  %v599_v0 = vpop.f32.mrb[18].mxu0  ;;  %1078 = vmatprep.mubr.bf16.mxu1 %v785_v58 }
 0x1a2   : > { %v600_v1 = vadd.f32 %v599_v0, %v3300_v43  ;;  %v601_v2 = vpop.f32.mrb[19].mxu0  ;;  %1079 = vmatmul.mubr.bf16.gmra.mrb[12].mxu1 %v784_v56  ;;  %v730_v6 = vmax.f32 %v596_v61, 0.0 }
 0x1a3   : > { %v602_v4 = vadd.f32 %v601_v2, %v3303_v44  ;;  %v731_v8 = vmax.f32 %v598_v63, 0.0 }
 0x1a4   : > { %v732_v7 = vmax.f32 %v600_v1, 0.0 }
 0x1a5   : > { %v733_v9 = vmax.f32 %v602_v4, 0.0 }
 0x1a6   : > { %v786_v10 = vpack.c.bf16 %v732_v7, %v730_v6 }
 0x1a7   : > { %v787_v12 = vpack.c.bf16 %v733_v9, %v731_v8  ;;  %v605_v13 = vpop.f32.mrb[20].mxu0 }
 0x1a8   : > { %v606_v15 = vadd.f32 %v605_v13, %v3300_v43  ;;  %v607_v16 = vpop.f32.mrb[21].mxu0 }
 0x1a9   : > { %v608_v17 = vadd.f32 %v607_v16, %v3303_v44  ;;  %v609_v18 = vpop.f32.mrb[22].mxu0  ;;  %1088 = vmatprep.mubr.bf16.mxu1 %v787_v12 }
 0x1aa   : > { %v610_v19 = vadd.f32 %v609_v18, %v3300_v43  ;;  %v611_v20 = vpop.f32.mrb[23].mxu0  ;;  %1089 = vmatmul.mubr.bf16.gmra.mrb[16].mxu1 %v786_v10  ;;  %v734_v23 = vmax.f32 %v606_v15, 0.0 }
 0x1ab   : > { %v612_v22 = vadd.f32 %v611_v20, %v3303_v44  ;;  %v735_v25 = vmax.f32 %v608_v17, 0.0 }
 0x1ac   : > { %v736_v24 = vmax.f32 %v610_v19, 0.0 }
 0x1ad   : > { %v737_v26 = vmax.f32 %v612_v22, 0.0 }
 0x1ae   : > { %v788_v27 = vpack.c.bf16 %v736_v24, %v734_v23 }
 0x1af   : > { %v789_v28 = vpack.c.bf16 %v737_v26, %v735_v25  ;;  %v615_v29 = vpop.f32.mrb[24].mxu0 }
 0x1b0   : > { %v616_v30 = vadd.f32 %v615_v29, %v3300_v43  ;;  %v617_v31 = vpop.f32.mrb[25].mxu0 }
 0x1b1   : > { %v618_v32 = vadd.f32 %v617_v31, %v3303_v44  ;;  %v619_v33 = vpop.f32.mrb[26].mxu0  ;;  %1098 = vmatprep.mubr.bf16.mxu1 %v789_v28 }
 0x1b2   : > { %v620_v34 = vadd.f32 %v619_v33, %v3300_v43  ;;  %v621_v35 = vpop.f32.mrb[27].mxu0  ;;  %1099 = vmatmul.mubr.bf16.gmra.mrb[20].mxu1 %v788_v27  ;;  %v738_v37 = vmax.f32 %v616_v30, 0.0 }
 0x1b3   : > { %v622_v36 = vadd.f32 %v621_v35, %v3303_v44  ;;  %v739_v41 = vmax.f32 %v618_v32, 0.0 }
 0x1b4   : > { %v740_v39 = vmax.f32 %v620_v34, 0.0 }
 0x1b5   : > { %v741_v42 = vmax.f32 %v622_v36, 0.0 }
 0x1b6   : > { %v790_v45 = vpack.c.bf16 %v740_v39, %v738_v37 }
 0x1b7   : > { %v791_v46 = vpack.c.bf16 %v741_v42, %v739_v41  ;;  %v625_v47 = vpop.f32.mrb[28].mxu0 }
 0x1b8   : > { %v626_v48 = vadd.f32 %v625_v47, %v3300_v43  ;;  %v627_v49 = vpop.f32.mrb[29].mxu0 }
 0x1b9   : > { %v628_v50 = vadd.f32 %v627_v49, %v3303_v44  ;;  %v629_v51 = vpop.f32.mrb[30].mxu0  ;;  %1108 = vmatprep.mubr.bf16.mxu1 %v791_v46 }
 0x1ba   : > { %v630_v52 = vadd.f32 %v629_v51, %v3300_v43  ;;  %v631_v53 = vpop.f32.mrb[31].mxu0  ;;  %1109 = vmatmul.mubr.bf16.gmra.mrb[24].mxu1 %v790_v45  ;;  %v742_v55 = vmax.f32 %v626_v48, 0.0 }
 0x1bb   : > { %v632_v54 = vadd.f32 %v631_v53, %v3303_v44  ;;  %v743_v57 = vmax.f32 %v628_v50, 0.0 }
 0x1bc   : > { %v744_v56 = vmax.f32 %v630_v52, 0.0 }
 0x1bd   : > { %v745_v58 = vmax.f32 %v632_v54, 0.0 }
 0x1be   : > { %v792_v59 = vpack.c.bf16 %v744_v56, %v742_v55 }
 0x1bf   : > { %v793_v60 = vpack.c.bf16 %v745_v58, %v743_v57  ;;  %v635_v61 = vpop.f32.mrb[32].mxu0 }
 0x1c0   : > { %v636_v62 = vadd.f32 %v635_v61, %v3300_v43  ;;  %v637_v63 = vpop.f32.mrb[33].mxu0 }
 0x1c1   : > { %v638_v0 = vadd.f32 %v637_v63, %v3303_v44  ;;  %v639_v1 = vpop.f32.mrb[34].mxu0  ;;  %1118 = vmatprep.mubr.bf16.mxu1 %v793_v60 }
 0x1c2   : > { %v640_v2 = vadd.f32 %v639_v1, %v3300_v43  ;;  %v641_v3 = vpop.f32.mrb[35].mxu0  ;;  %1119 = vmatmul.mubr.bf16.gmra.mrb[28].mxu1 %v792_v59  ;;  %v746_v5 = vmax.f32 %v636_v62, 0.0 }
 0x1c3   : > { %v642_v4 = vadd.f32 %v641_v3, %v3303_v44  ;;  %v747_v7 = vmax.f32 %v638_v0, 0.0  ;;  %v2804_v0 = vld [vmem:[#allocation5 + $0x2f4] ss:$8 sps:$4 sm:$0xff]  }
 0x1c4   : > { %v748_v6 = vmax.f32 %v640_v2, 0.0  ;;  %v2802_v2 = vld [vmem:[#allocation5 + $0x2f0] ss:$8 sps:$4 sm:$0xff]   ;;  %1541 = vmatprep.subr.bf16.mxu0 %v2804_v0  ;;  %v2816_v0 = vld [vmem:[#allocation5 + $0x334] ss:$8 sps:$4 sm:$0xff]  }
 0x1c5   : > { %v749_v8 = vmax.f32 %v642_v4, 0.0  ;;  %1542 = vmatpush1.bf16.msra.mxu0 %v2802_v2 }
 0x1c6   : > { %v794_v9 = vpack.c.bf16 %v748_v6, %v746_v5 }
 0x1c7   : > { %v795_v10 = vpack.c.bf16 %v749_v8, %v747_v7  ;;  %v645_v11 = vpop.f32.mrb[36].mxu0 }
 0x1c8   : > { %v646_v12 = vadd.f32 %v645_v11, %v3300_v43  ;;  %v647_v13 = vpop.f32.mrb[37].mxu0 }
 0x1c9   : > { %v648_v14 = vadd.f32 %v647_v13, %v3303_v44  ;;  %v649_v15 = vpop.f32.mrb[38].mxu0  ;;  %1128 = vmatprep.mubr.bf16.mxu1 %v795_v10 }
 0x1ca   : > { %v650_v16 = vadd.f32 %v649_v15, %v3300_v43  ;;  %v651_v17 = vpop.f32.mrb[39].mxu0  ;;  %1129 = vmatmul.mubr.bf16.gmra.mrb[32].mxu1 %v794_v9  ;;  %v750_v19 = vmax.f32 %v646_v12, 0.0 }
 0x1cb   : > { %v652_v18 = vadd.f32 %v651_v17, %v3303_v44  ;;  %v751_v21 = vmax.f32 %v648_v14, 0.0 }
 0x1cc   : > { %v752_v20 = vmax.f32 %v650_v16, 0.0 }
 0x1cd   : > { %v753_v22 = vmax.f32 %v652_v18, 0.0 }
 0x1ce   : > { %v796_v23 = vpack.c.bf16 %v752_v20, %v750_v19 }
 0x1cf   : > { %v797_v24 = vpack.c.bf16 %v753_v22, %v751_v21  ;;  %v655_v25 = vpop.f32.mrb[40].mxu0 }
 0x1d0   : > { %v656_v26 = vadd.f32 %v655_v25, %v3300_v43  ;;  %v657_v27 = vpop.f32.mrb[41].mxu0 }
 0x1d1   : > { %v658_v28 = vadd.f32 %v657_v27, %v3303_v44  ;;  %v659_v29 = vpop.f32.mrb[42].mxu0  ;;  %1138 = vmatprep.mubr.bf16.mxu1 %v797_v24 }
 0x1d2   : > { %v660_v30 = vadd.f32 %v659_v29, %v3300_v43  ;;  %v661_v31 = vpop.f32.mrb[43].mxu0  ;;  %1139 = vmatmul.mubr.bf16.gmra.mrb[36].mxu1 %v796_v23  ;;  %v754_v33 = vmax.f32 %v656_v26, 0.0 }
 0x1d3   : > { %v662_v32 = vadd.f32 %v661_v31, %v3303_v44  ;;  %v755_v35 = vmax.f32 %v658_v28, 0.0 }
 0x1d4   : > { %v756_v34 = vmax.f32 %v660_v30, 0.0 }
 0x1d5   : > { %v757_v36 = vmax.f32 %v662_v32, 0.0 }
 0x1d6   : > { %v798_v37 = vpack.c.bf16 %v756_v34, %v754_v33 }
 0x1d7   : > { %v799_v39 = vpack.c.bf16 %v757_v36, %v755_v35  ;;  %v665_v41 = vpop.f32.mrb[44].mxu0 }
 0x1d8   : > { %v666_v42 = vadd.f32 %v665_v41, %v3300_v43  ;;  %v667_v45 = vpop.f32.mrb[45].mxu0 }
 0x1d9   : > { %v668_v46 = vadd.f32 %v667_v45, %v3303_v44  ;;  %v669_v47 = vpop.f32.mrb[46].mxu0  ;;  %1148 = vmatprep.mubr.bf16.mxu1 %v799_v39 }
 0x1da   : > { %v670_v48 = vadd.f32 %v669_v47, %v3300_v43  ;;  %v671_v49 = vpop.f32.mrb[47].mxu0  ;;  %1149 = vmatmul.mubr.bf16.gmra.mrb[40].mxu1 %v798_v37  ;;  %v758_v51 = vmax.f32 %v666_v42, 0.0 }
 0x1db   : > { %v672_v50 = vadd.f32 %v671_v49, %v3303_v44  ;;  %v759_v53 = vmax.f32 %v668_v46, 0.0 }
 0x1dc   : > { %v760_v52 = vmax.f32 %v670_v48, 0.0 }
 0x1dd   : > { %v761_v54 = vmax.f32 %v672_v50, 0.0 }
 0x1de   : > { %v800_v55 = vpack.c.bf16 %v760_v52, %v758_v51 }
 0x1df   : > { %v801_v56 = vpack.c.bf16 %v761_v54, %v759_v53  ;;  %v675_v57 = vpop.f32.mrb[48].mxu0 }
 0x1e0   : > { %v676_v58 = vadd.f32 %v675_v57, %v3300_v43  ;;  %v677_v59 = vpop.f32.mrb[49].mxu0  ;;  %v2808_v57 = vld [vmem:[#allocation5 + $0x310] ss:$8 sps:$4 sm:$0xff]  }
 0x1e1   : > { %v678_v60 = vadd.f32 %v677_v59, %v3303_v44  ;;  %v679_v61 = vpop.f32.mrb[50].mxu0  ;;  %1158 = vmatprep.mubr.bf16.mxu1 %v801_v56  ;;  %v2807_v56 = vld [vmem:[#allocation5 + $0x304] ss:$8 sps:$4 sm:$0xff]   ;;  %v2811_v59 = vld [vmem:[#allocation5 + $0x320] ss:$8 sps:$4 sm:$0xff]  }
 0x1e2   : > { %v680_v62 = vadd.f32 %v679_v61, %v3300_v43  ;;  %v681_v63 = vpop.f32.mrb[51].mxu0  ;;  %1159 = vmatmul.mubr.bf16.gmra.mrb[44].mxu1 %v800_v55  ;;  %v762_v3 = vmax.f32 %v676_v58, 0.0  ;;  %v2805_v55 = vld [vmem:[#allocation5 + $0x300] ss:$8 sps:$4 sm:$0xff]   ;;  %2006 = vmatprep.subr.bf16.mxu1 %v2807_v56  ;;  %v2810_v58 = vld [vmem:[#allocation5 + $0x314] ss:$8 sps:$4 sm:$0xff]  }
 0x1e3   : > { %v682_v1 = vadd.f32 %v681_v63, %v3303_v44  ;;  %v763_v5 = vmax.f32 %v678_v60, 0.0  ;;  %2007 = vmatpush1.bf16.msra.mxu1 %v2805_v55  ;;  %v2813_v60 = vld [vmem:[#allocation5 + $0x324] ss:$8 sps:$4 sm:$0xff]   ;;  %v2814_v63 = vld [vmem:[#allocation5 + $0x330] ss:$8 sps:$4 sm:$0xff]  }
 0x1e4   : > { %v764_v4 = vmax.f32 %v680_v62, 0.0  ;;  %2008 = vmatprep.subr.bf16.mxu1 %v2810_v58  ;;  %v2832_v56 = vld [vmem:[#allocation5 + $0x390] ss:$8 sps:$4 sm:$0xff]  }
 0x1e5   : > { %v765_v6 = vmax.f32 %v682_v1, 0.0 }
 0x1e6   : > { %v802_v7 = vpack.c.bf16 %v764_v4, %v762_v3 }
 0x1e7   : > { %v803_v8 = vpack.c.bf16 %v765_v6, %v763_v5  ;;  %v685_v9 = vpop.f32.mrb[52].mxu0  ;;  %2009 = vmatpush1.bf16.msra.mxu1 %v2808_v57 }
 0x1e8   : > { %v686_v10 = vadd.f32 %v685_v9, %v3300_v43  ;;  %v687_v11 = vpop.f32.mrb[53].mxu0  ;;  %2010 = vmatprep.subr.bf16.mxu1 %v2813_v60 }
 0x1e9   : > { %v688_v12 = vadd.f32 %v687_v11, %v3303_v44  ;;  %v689_v13 = vpop.f32.mrb[54].mxu0  ;;  %1168 = vmatprep.mubr.bf16.mxu1 %v803_v8  ;;  %v2819_v8 = vld [vmem:[#allocation5 + $0x344] ss:$8 sps:$4 sm:$0xff]  }
 0x1ea   : > { %v690_v14 = vadd.f32 %v689_v13, %v3300_v43  ;;  %v691_v15 = vpop.f32.mrb[55].mxu0  ;;  %1169 = vmatmul.mubr.bf16.gmra.mrb[48].mxu1 %v802_v7  ;;  %v766_v17 = vmax.f32 %v686_v10, 0.0  ;;  %v2817_v7 = vld [vmem:[#allocation5 + $0x340] ss:$8 sps:$4 sm:$0xff]   ;;  %v2822_v10 = vld [vmem:[#allocation5 + $0x354] ss:$8 sps:$4 sm:$0xff]  }
 0x1eb   : > { %v692_v16 = vadd.f32 %v691_v15, %v3303_v44  ;;  %v767_v19 = vmax.f32 %v688_v12, 0.0  ;;  %2011 = vmatpush1.bf16.msra.mxu1 %v2811_v59 }
 0x1ec   : > { %v768_v18 = vmax.f32 %v690_v14, 0.0  ;;  %2012 = vmatprep.subr.bf16.mxu1 %v2816_v0 }
 0x1ed   : > { %v769_v20 = vmax.f32 %v692_v16, 0.0  ;;  %v2820_v16 = vld [vmem:[#allocation5 + $0x350] ss:$8 sps:$4 sm:$0xff]  }
 0x1ee   : > { %v804_v21 = vpack.c.bf16 %v768_v18, %v766_v17 }
 0x1ef   : > { %v805_v22 = vpack.c.bf16 %v769_v20, %v767_v19  ;;  %v695_v23 = vpop.f32.mrb[56].mxu0  ;;  %2013 = vmatpush1.bf16.msra.mxu1 %v2814_v63  ;;  %v2825_v19 = vld [vmem:[#allocation5 + $0x364] ss:$8 sps:$4 sm:$0xff]  }
 0x1f0   : > { %v696_v24 = vadd.f32 %v695_v23, %v3300_v43  ;;  %v697_v25 = vpop.f32.mrb[57].mxu0  ;;  %2014 = vmatprep.subr.bf16.mxu1 %v2819_v8 }
 0x1f1   : > { %v698_v26 = vadd.f32 %v697_v25, %v3303_v44  ;;  %v699_v27 = vpop.f32.mrb[58].mxu0  ;;  %1178 = vmatprep.mubr.bf16.mxu1 %v805_v22 }
 0x1f2   : > { %v700_v28 = vadd.f32 %v699_v27, %v3300_v43  ;;  %v701_v29 = vpop.f32.mrb[59].mxu0  ;;  %1179 = vmatmul.mubr.bf16.gmra.mrb[52].mxu1 %v804_v21  ;;  %v770_v31 = vmax.f32 %v696_v24, 0.0 }
 0x1f3   : > { %v702_v30 = vadd.f32 %v701_v29, %v3303_v44  ;;  %v771_v33 = vmax.f32 %v698_v26, 0.0  ;;  %2015 = vmatpush1.bf16.msra.mxu1 %v2817_v7  ;;  %v2823_v26 = vld [vmem:[#allocation5 + $0x360] ss:$8 sps:$4 sm:$0xff]  }
 0x1f4   : > { %v772_v32 = vmax.f32 %v700_v28, 0.0  ;;  %2016 = vmatprep.subr.bf16.mxu1 %v2822_v10  ;;  %v2828_v28 = vld [vmem:[#allocation5 + $0x374] ss:$8 sps:$4 sm:$0xff]   ;;  %v2838_v10 = vld [vmem:[#allocation5 + $0x3b0] ss:$8 sps:$4 sm:$0xff]  }
 0x1f5   : > { %v773_v34 = vmax.f32 %v702_v30, 0.0 }
 0x1f6   : > { %v806_v35 = vpack.c.bf16 %v772_v32, %v770_v31 }
 0x1f7   : > { %v807_v36 = vpack.c.bf16 %v773_v34, %v771_v33  ;;  %v705_v37 = vpop.f32.mrb[60].mxu0  ;;  %2017 = vmatpush1.bf16.msra.mxu1 %v2820_v16  ;;  %v2826_v34 = vld [vmem:[#allocation5 + $0x370] ss:$8 sps:$4 sm:$0xff]  }
 0x1f8   : > { %v706_v39 = vadd.f32 %v705_v37, %v3300_v43  ;;  %v707_v41 = vpop.f32.mrb[61].mxu0  ;;  %2018 = vmatprep.subr.bf16.mxu1 %v2825_v19  ;;  %v2831_v37 = vld [vmem:[#allocation5 + $0x384] ss:$8 sps:$4 sm:$0xff]  }
 0x1f9   : > { %v708_v42 = vadd.f32 %v707_v41, %v3303_v44  ;;  %v709_v45 = vpop.f32.mrb[62].mxu0  ;;  %1188 = vmatprep.mubr.bf16.mxu1 %v807_v36 }
 0x1fa   : > { %v710_v46 = vadd.f32 %v709_v45, %v3300_v43  ;;  %v711_v47 = vpop.f32.mrb[63].mxu0  ;;  %1189 = vmatmul.mubr.bf16.gmra.mrb[56].mxu1 %v806_v35  ;;  %v774_v49 = vmax.f32 %v706_v39, 0.0  ;;  %v844_v43 = vld [vmem:[#allocation7 + $0x2] sm:$0x3] }
 0x1fb   : > { %v712_v48 = vadd.f32 %v711_v47, %v3303_v44  ;;  %v775_v51 = vmax.f32 %v708_v42, 0.0  ;;  %v3370_v44 = vrot.slane %v844_v43, %v3295_v38  ;;  %v3373_v61 = vrot.slane %v844_v43, %v3297_v40  ;;  %2019 = vmatpush1.bf16.msra.mxu1 %v2823_v26  ;;  %v2837_v43 = vld [vmem:[#allocation5 + $0x3a4] ss:$8 sps:$4 sm:$0xff]  }
 0x1fc   : > { %v776_v50 = vmax.f32 %v710_v46, 0.0  ;;  %2020 = vmatprep.subr.bf16.mxu1 %v2828_v28  ;;  %v2844_v28 = vld [vmem:[#allocation5 + $0x3d0] ss:$8 sps:$4 sm:$0xff]  }
 0x1fd   : > { %v777_v52 = vmax.f32 %v712_v48, 0.0  ;;  %v2829_v48 = vld [vmem:[#allocation5 + $0x380] ss:$8 sps:$4 sm:$0xff]  }
 0x1fe   : > { %v808_v53 = vpack.c.bf16 %v776_v50, %v774_v49  ;;  %v2834_v50 = vld [vmem:[#allocation5 + $0x394] ss:$8 sps:$4 sm:$0xff]  }
 0x1ff   : > { %v809_v54 = vpack.c.bf16 %v777_v52, %v775_v51  ;;  %2021 = vmatpush1.bf16.msra.mxu1 %v2826_v34 }
 0x200   : > { %2022 = vmatprep.subr.bf16.mxu1 %v2831_v37 }
 0x201   : > { %1198 = vmatprep.mubr.bf16.mxu1 %v809_v54 }
 0x202   : > { %1199 = vmatmul.mubr.bf16.gmra.mrb[60].mxu1 %v808_v53 }
 0x203   : > { %2023 = vmatpush1.bf16.msra.mxu1 %v2829_v48 }
 0x204   : > { %2024 = vmatprep.subr.bf16.mxu1 %v2834_v50 }
 0x207   : > { %2025 = vmatpush1.bf16.msra.mxu1 %v2832_v56 }
 0x208   : > { %2026 = vmatprep.subr.bf16.mxu1 %v2837_v43 }
 0x25d   : > { %v1050_v62 = vpop.f32.mrb[0].mxu1 }
 0x25e   : > { %v1051_v1 = vadd.f32 %v1050_v62, %v3370_v44  ;;  %v1052_v2 = vpop.f32.mrb[1].mxu1 }
 0x25f   : > { %v1053_v3 = vadd.f32 %v1052_v2, %v3373_v61  ;;  %v1054_v4 = vpop.f32.mrb[2].mxu1  ;;  %v2835_v2 = vld [vmem:[#allocation5 + $0x3a0] ss:$8 sps:$4 sm:$0xff]  }
 0x260   : > { %v1055_v5 = vadd.f32 %v1054_v4, %v3370_v44  ;;  %v1056_v6 = vpop.f32.mrb[3].mxu1  ;;  %v1209_v11 = vmax.f32 %v1051_v1, 0.0  ;;  %v2840_v4 = vld [vmem:[#allocation5 + $0x3b4] ss:$8 sps:$4 sm:$0xff]   ;;  %2027 = vmatpush1.bf16.msra.mxu1 %v2835_v2 }
 0x261   : > { %v1057_v9 = vadd.f32 %v1056_v6, %v3373_v61  ;;  %v1210_v13 = vmax.f32 %v1053_v3, 0.0  ;;  %2028 = vmatprep.subr.bf16.mxu1 %v2840_v4 }
 0x262   : > { %v1211_v12 = vmax.f32 %v1055_v5, 0.0 }
 0x263   : > { %v1212_v14 = vmax.f32 %v1057_v9, 0.0 }
 0x264   : > { %v1273_v15 = vpack.c.bf16 %v1211_v12, %v1209_v11  ;;  %2029 = vmatpush1.bf16.msra.mxu1 %v2838_v10 }
 0x265   : > { %v1274_v17 = vpack.c.bf16 %v1212_v14, %v1210_v13  ;;  %v1060_v18 = vpop.f32.mrb[4].mxu1  ;;  %v2843_v13 = vld [vmem:[#allocation5 + $0x3c4] ss:$8 sps:$4 sm:$0xff]  }
 0x266   : > { %v1061_v20 = vadd.f32 %v1060_v18, %v3370_v44  ;;  %v1062_v21 = vpop.f32.mrb[5].mxu1  ;;  %2030 = vmatprep.subr.bf16.mxu1 %v2843_v13 }
 0x267   : > { %v1063_v22 = vadd.f32 %v1062_v21, %v3373_v61  ;;  %v1064_v23 = vpop.f32.mrb[6].mxu1  ;;  %1543 = vmatprep.mubr.bf16.mxu0 %v1274_v17 }
 0x268   : > { %v1065_v24 = vadd.f32 %v1064_v23, %v3370_v44  ;;  %v1066_v25 = vpop.f32.mrb[7].mxu1  ;;  %1544 = vmatmul.mubr.bf16.vlgmr.msra.gmra.mrb[64].mxu0 %v1273_v15  ;;  %v1213_v29 = vmax.f32 %v1061_v20, 0.0  ;;  %v2841_v20 = vld [vmem:[#allocation5 + $0x3c0] ss:$8 sps:$4 sm:$0xff]  }
 0x269   : > { %v1067_v27 = vadd.f32 %v1066_v25, %v3373_v61  ;;  %v1214_v31 = vmax.f32 %v1063_v22, 0.0  ;;  %v2846_v22 = vld [vmem:[#allocation5 + $0x3d4] ss:$8 sps:$4 sm:$0xff]   ;;  %2031 = vmatpush1.bf16.msra.mxu1 %v2841_v20 }
 0x26a   : > { %v1215_v30 = vmax.f32 %v1065_v24, 0.0  ;;  %2032 = vmatprep.subr.bf16.mxu1 %v2846_v22 }
 0x26b   : > { %v1216_v32 = vmax.f32 %v1067_v27, 0.0 }
 0x26c   : > { %v1275_v33 = vpack.c.bf16 %v1215_v30, %v1213_v29 }
 0x26d   : > { %v1276_v35 = vpack.c.bf16 %v1216_v32, %v1214_v31  ;;  %v1070_v36 = vpop.f32.mrb[8].mxu1  ;;  %v2849_v31 = vld [vmem:[#allocation5 + $0x3e4] ss:$8 sps:$4 sm:$0xff]   ;;  %2033 = vmatpush1.bf16.msra.mxu1 %v2844_v28 }
 0x26e   : > { %v1071_v39 = vadd.f32 %v1070_v36, %v3370_v44  ;;  %v1072_v41 = vpop.f32.mrb[9].mxu1  ;;  %2034 = vmatprep.subr.bf16.mxu1 %v2849_v31 }
 0x26f   : > { %v1073_v42 = vadd.f32 %v1072_v41, %v3373_v61  ;;  %v1074_v45 = vpop.f32.mrb[10].mxu1  ;;  %1553 = vmatprep.mubr.bf16.mxu0 %v1276_v35 }
 0x270   : > { %v1075_v46 = vadd.f32 %v1074_v45, %v3370_v44  ;;  %v1076_v47 = vpop.f32.mrb[11].mxu1  ;;  %1554 = vmatmul.mubr.bf16.gmra.mrb[68].mxu0 %v1275_v33  ;;  %v1217_v51 = vmax.f32 %v1071_v39, 0.0  ;;  %v2847_v39 = vld [vmem:[#allocation5 + $0x3e0] ss:$8 sps:$4 sm:$0xff]  }
 0x271   : > { %v1077_v49 = vadd.f32 %v1076_v47, %v3373_v61  ;;  %v1218_v53 = vmax.f32 %v1073_v42, 0.0  ;;  %2035 = vmatpush1.bf16.msra.mxu1 %v2847_v39 }
 0x272   : > { %v1219_v52 = vmax.f32 %v1075_v46, 0.0 }
 0x273   : > { %v1220_v54 = vmax.f32 %v1077_v49, 0.0 }
 0x274   : > { %v1277_v55 = vpack.c.bf16 %v1219_v52, %v1217_v51 }
 0x275   : > { %v1278_v57 = vpack.c.bf16 %v1220_v54, %v1218_v53  ;;  %v1080_v58 = vpop.f32.mrb[12].mxu1 }
 0x276   : > { %v1081_v59 = vadd.f32 %v1080_v58, %v3370_v44  ;;  %v1082_v60 = vpop.f32.mrb[13].mxu1 }
 0x277   : > { %v1083_v62 = vadd.f32 %v1082_v60, %v3373_v61  ;;  %v1084_v63 = vpop.f32.mrb[14].mxu1  ;;  %1563 = vmatprep.mubr.bf16.mxu0 %v1278_v57 }
 0x278   : > { %v1085_v0 = vadd.f32 %v1084_v63, %v3370_v44  ;;  %v1086_v1 = vpop.f32.mrb[15].mxu1  ;;  %1564 = vmatmul.mubr.bf16.gmra.mrb[72].mxu0 %v1277_v55  ;;  %v1221_v5 = vmax.f32 %v1081_v59, 0.0 }
 0x279   : > { %v1087_v3 = vadd.f32 %v1086_v1, %v3373_v61  ;;  %v1222_v7 = vmax.f32 %v1083_v62, 0.0 }
 0x27a   : > { %v1223_v6 = vmax.f32 %v1085_v0, 0.0 }
 0x27b   : > { %v1224_v8 = vmax.f32 %v1087_v3, 0.0 }
 0x27c   : > { %v1279_v9 = vpack.c.bf16 %v1223_v6, %v1221_v5 }
 0x27d   : > { %v1280_v11 = vpack.c.bf16 %v1224_v8, %v1222_v7  ;;  %v1090_v12 = vpop.f32.mrb[16].mxu1 }
 0x27e   : > { %v1091_v14 = vadd.f32 %v1090_v12, %v3370_v44  ;;  %v1092_v15 = vpop.f32.mrb[17].mxu1 }
 0x27f   : > { %v1093_v16 = vadd.f32 %v1092_v15, %v3373_v61  ;;  %v1094_v17 = vpop.f32.mrb[18].mxu1  ;;  %1573 = vmatprep.mubr.bf16.mxu0 %v1280_v11 }
 0x280   : > { %v1095_v18 = vadd.f32 %v1094_v17, %v3370_v44  ;;  %v1096_v19 = vpop.f32.mrb[19].mxu1  ;;  %1574 = vmatmul.mubr.bf16.gmra.mrb[76].mxu0 %v1279_v9  ;;  %v1225_v23 = vmax.f32 %v1091_v14, 0.0 }
 0x281   : > { %v1097_v21 = vadd.f32 %v1096_v19, %v3373_v61  ;;  %v1226_v25 = vmax.f32 %v1093_v16, 0.0 }
 0x282   : > { %v1227_v24 = vmax.f32 %v1095_v18, 0.0 }
 0x283   : > { %v1228_v26 = vmax.f32 %v1097_v21, 0.0 }
 0x284   : > { %v1281_v27 = vpack.c.bf16 %v1227_v24, %v1225_v23 }
 0x285   : > { %v1282_v29 = vpack.c.bf16 %v1228_v26, %v1226_v25  ;;  %v1100_v30 = vpop.f32.mrb[20].mxu1 }
 0x286   : > { %v1101_v32 = vadd.f32 %v1100_v30, %v3370_v44  ;;  %v1102_v33 = vpop.f32.mrb[21].mxu1 }
 0x287   : > { %v1103_v34 = vadd.f32 %v1102_v33, %v3373_v61  ;;  %v1104_v35 = vpop.f32.mrb[22].mxu1  ;;  %1583 = vmatprep.mubr.bf16.mxu0 %v1282_v29 }
 0x288   : > { %v1105_v36 = vadd.f32 %v1104_v35, %v3370_v44  ;;  %v1106_v37 = vpop.f32.mrb[23].mxu1  ;;  %1584 = vmatmul.mubr.bf16.gmra.mrb[80].mxu0 %v1281_v27  ;;  %v1229_v42 = vmax.f32 %v1101_v32, 0.0 }
 0x289   : > { %v1107_v41 = vadd.f32 %v1106_v37, %v3373_v61  ;;  %v1230_v46 = vmax.f32 %v1103_v34, 0.0 }
 0x28a   : > { %v1231_v45 = vmax.f32 %v1105_v36, 0.0 }
 0x28b   : > { %v1232_v47 = vmax.f32 %v1107_v41, 0.0 }
 0x28c   : > { %v1283_v48 = vpack.c.bf16 %v1231_v45, %v1229_v42 }
 0x28d   : > { %v1284_v49 = vpack.c.bf16 %v1232_v47, %v1230_v46  ;;  %v1110_v50 = vpop.f32.mrb[24].mxu1 }
 0x28e   : > { %v1111_v51 = vadd.f32 %v1110_v50, %v3370_v44  ;;  %v1112_v52 = vpop.f32.mrb[25].mxu1 }
 0x28f   : > { %v1113_v53 = vadd.f32 %v1112_v52, %v3373_v61  ;;  %v1114_v54 = vpop.f32.mrb[26].mxu1  ;;  %1593 = vmatprep.mubr.bf16.mxu0 %v1284_v49 }
 0x290   : > { %v1115_v55 = vadd.f32 %v1114_v54, %v3370_v44  ;;  %v1116_v56 = vpop.f32.mrb[27].mxu1  ;;  %1594 = vmatmul.mubr.bf16.gmra.mrb[84].mxu0 %v1283_v48  ;;  %v1233_v58 = vmax.f32 %v1111_v51, 0.0 }
 0x291   : > { %v1117_v57 = vadd.f32 %v1116_v56, %v3373_v61  ;;  %v1234_v59 = vmax.f32 %v1113_v53, 0.0 }
 0x292   : > { %v1235_v43 = vmax.f32 %v1115_v55, 0.0 }
 0x293   : > { %v1236_v60 = vmax.f32 %v1117_v57, 0.0 }
 0x294   : > { %v1285_v62 = vpack.c.bf16 %v1235_v43, %v1233_v58 }
 0x295   : > { %v1286_v63 = vpack.c.bf16 %v1236_v60, %v1234_v59  ;;  %v1120_v0 = vpop.f32.mrb[28].mxu1 }
 0x296   : > { %v1121_v1 = vadd.f32 %v1120_v0, %v3370_v44  ;;  %v1122_v2 = vpop.f32.mrb[29].mxu1 }
 0x297   : > { %v1123_v3 = vadd.f32 %v1122_v2, %v3373_v61  ;;  %v1124_v4 = vpop.f32.mrb[30].mxu1  ;;  %1603 = vmatprep.mubr.bf16.mxu0 %v1286_v63 }
 0x298   : > { %v1125_v5 = vadd.f32 %v1124_v4, %v3370_v44  ;;  %v1126_v6 = vpop.f32.mrb[31].mxu1  ;;  %1604 = vmatmul.mubr.bf16.gmra.mrb[88].mxu0 %v1285_v62  ;;  %v1237_v8 = vmax.f32 %v1121_v1, 0.0 }
 0x299   : > { %v1127_v7 = vadd.f32 %v1126_v6, %v3373_v61  ;;  %v1238_v10 = vmax.f32 %v1123_v3, 0.0 }
 0x29a   : > { %v1239_v9 = vmax.f32 %v1125_v5, 0.0 }
 0x29b   : > { %v1240_v11 = vmax.f32 %v1127_v7, 0.0 }
 0x29c   : > { %v1287_v12 = vpack.c.bf16 %v1239_v9, %v1237_v8 }
 0x29d   : > { %v1288_v13 = vpack.c.bf16 %v1240_v11, %v1238_v10  ;;  %v1130_v14 = vpop.f32.mrb[32].mxu1 }
 0x29e   : > { %v1131_v15 = vadd.f32 %v1130_v14, %v3370_v44  ;;  %v1132_v16 = vpop.f32.mrb[33].mxu1 }
 0x29f   : > { %v1133_v17 = vadd.f32 %v1132_v16, %v3373_v61  ;;  %v1134_v18 = vpop.f32.mrb[34].mxu1  ;;  %1613 = vmatprep.mubr.bf16.mxu0 %v1288_v13 }
 0x2a0   : > { %v1135_v19 = vadd.f32 %v1134_v18, %v3370_v44  ;;  %v1136_v20 = vpop.f32.mrb[35].mxu1  ;;  %1614 = vmatmul.mubr.bf16.gmra.mrb[92].mxu0 %v1287_v12  ;;  %v1241_v22 = vmax.f32 %v1131_v15, 0.0 }
 0x2a1   : > { %v1137_v21 = vadd.f32 %v1136_v20, %v3373_v61  ;;  %v1242_v24 = vmax.f32 %v1133_v17, 0.0  ;;  %v2852_v17 = vld [vmem:[#allocation5 + $0x3f4] ss:$8 sps:$4 sm:$0xff]  }
 0x2a2   : > { %v1243_v23 = vmax.f32 %v1135_v19, 0.0  ;;  %v2850_v19 = vld [vmem:[#allocation5 + $0x3f0] ss:$8 sps:$4 sm:$0xff]   ;;  %2036 = vmatprep.subr.bf16.mxu1 %v2852_v17 }
 0x2a3   : > { %v1244_v25 = vmax.f32 %v1137_v21, 0.0  ;;  %2037 = vmatpush1.bf16.msra.mxu1 %v2850_v19 }
 0x2a4   : > { %v1289_v26 = vpack.c.bf16 %v1243_v23, %v1241_v22 }
 0x2a5   : > { %v1290_v27 = vpack.c.bf16 %v1244_v25, %v1242_v24  ;;  %v1140_v28 = vpop.f32.mrb[36].mxu1 }
 0x2a6   : > { %v1141_v29 = vadd.f32 %v1140_v28, %v3370_v44  ;;  %v1142_v30 = vpop.f32.mrb[37].mxu1 }
 0x2a7   : > { %v1143_v31 = vadd.f32 %v1142_v30, %v3373_v61  ;;  %v1144_v32 = vpop.f32.mrb[38].mxu1  ;;  %1623 = vmatprep.mubr.bf16.mxu0 %v1290_v27 }
 0x2a8   : > { %v1145_v33 = vadd.f32 %v1144_v32, %v3370_v44  ;;  %v1146_v34 = vpop.f32.mrb[39].mxu1  ;;  %1624 = vmatmul.mubr.bf16.gmra.mrb[96].mxu0 %v1289_v26  ;;  %v1245_v36 = vmax.f32 %v1141_v29, 0.0 }
 0x2a9   : > { %v1147_v35 = vadd.f32 %v1146_v34, %v3373_v61  ;;  %v1246_v39 = vmax.f32 %v1143_v31, 0.0 }
 0x2aa   : > { %v1247_v37 = vmax.f32 %v1145_v33, 0.0 }
 0x2ab   : > { %v1248_v41 = vmax.f32 %v1147_v35, 0.0 }
 0x2ac   : > { %v1291_v42 = vpack.c.bf16 %v1247_v37, %v1245_v36 }
 0x2ad   : > { %v1292_v45 = vpack.c.bf16 %v1248_v41, %v1246_v39  ;;  %v1150_v46 = vpop.f32.mrb[40].mxu1 }
 0x2ae   : > { %v1151_v47 = vadd.f32 %v1150_v46, %v3370_v44  ;;  %v1152_v48 = vpop.f32.mrb[41].mxu1 }
 0x2af   : > { %v1153_v49 = vadd.f32 %v1152_v48, %v3373_v61  ;;  %v1154_v50 = vpop.f32.mrb[42].mxu1  ;;  %1633 = vmatprep.mubr.bf16.mxu0 %v1292_v45 }
 0x2b0   : > { %v1155_v51 = vadd.f32 %v1154_v50, %v3370_v44  ;;  %v1156_v52 = vpop.f32.mrb[43].mxu1  ;;  %1634 = vmatmul.mubr.bf16.gmra.mrb[100].mxu0 %v1291_v42  ;;  %v1249_v54 = vmax.f32 %v1151_v47, 0.0 }
 0x2b1   : > { %v1157_v53 = vadd.f32 %v1156_v52, %v3373_v61  ;;  %v1250_v56 = vmax.f32 %v1153_v49, 0.0 }
 0x2b2   : > { %v1251_v55 = vmax.f32 %v1155_v51, 0.0 }
 0x2b3   : > { %v1252_v57 = vmax.f32 %v1157_v53, 0.0 }
 0x2b4   : > { %v1293_v58 = vpack.c.bf16 %v1251_v55, %v1249_v54 }
 0x2b5   : > { %v1294_v43 = vpack.c.bf16 %v1252_v57, %v1250_v56  ;;  %v1160_v59 = vpop.f32.mrb[44].mxu1 }
 0x2b6   : > { %v1161_v60 = vadd.f32 %v1160_v59, %v3370_v44  ;;  %v1162_v62 = vpop.f32.mrb[45].mxu1 }
 0x2b7   : > { %v1163_v63 = vadd.f32 %v1162_v62, %v3373_v61  ;;  %v1164_v0 = vpop.f32.mrb[46].mxu1  ;;  %1643 = vmatprep.mubr.bf16.mxu0 %v1294_v43 }
 0x2b8   : > { %v1165_v1 = vadd.f32 %v1164_v0, %v3370_v44  ;;  %v1166_v2 = vpop.f32.mrb[47].mxu1  ;;  %1644 = vmatmul.mubr.bf16.gmra.mrb[104].mxu0 %v1293_v58  ;;  %v1253_v4 = vmax.f32 %v1161_v60, 0.0 }
 0x2b9   : > { %v1167_v3 = vadd.f32 %v1166_v2, %v3373_v61  ;;  %v1254_v6 = vmax.f32 %v1163_v63, 0.0 }
 0x2ba   : > { %v1255_v5 = vmax.f32 %v1165_v1, 0.0 }
 0x2bb   : > { %v1256_v7 = vmax.f32 %v1167_v3, 0.0 }
 0x2bc   : > { %v1295_v8 = vpack.c.bf16 %v1255_v5, %v1253_v4 }
 0x2bd   : > { %v1296_v9 = vpack.c.bf16 %v1256_v7, %v1254_v6  ;;  %v1170_v10 = vpop.f32.mrb[48].mxu1 }
 0x2be   : > { %v1171_v11 = vadd.f32 %v1170_v10, %v3370_v44  ;;  %v1172_v12 = vpop.f32.mrb[49].mxu1 }
 0x2bf   : > { %v1173_v13 = vadd.f32 %v1172_v12, %v3373_v61  ;;  %v1174_v14 = vpop.f32.mrb[50].mxu1  ;;  %1653 = vmatprep.mubr.bf16.mxu0 %v1296_v9 }
 0x2c0   : > { %v1175_v15 = vadd.f32 %v1174_v14, %v3370_v44  ;;  %v1176_v16 = vpop.f32.mrb[51].mxu1  ;;  %1654 = vmatmul.mubr.bf16.gmra.mrb[108].mxu0 %v1295_v8  ;;  %v1257_v20 = vmax.f32 %v1171_v11, 0.0  ;;  %v1339_v8 = vld [vmem:[#allocation7 + $0x4] sm:$0x3] }
 0x2c1   : > { %v1177_v18 = vadd.f32 %v1176_v16, %v3373_v61  ;;  %v1258_v22 = vmax.f32 %v1173_v13, 0.0  ;;  %v3440_v9 = vrot.slane %v1339_v8, %v3295_v38  ;;  %v3443_v10 = vrot.slane %v1339_v8, %v3297_v40 }
 0x2c2   : > { %v1259_v21 = vmax.f32 %v1175_v15, 0.0 }
 0x2c3   : > { %v1260_v23 = vmax.f32 %v1177_v18, 0.0 }
 0x2c4   : > { %v1297_v24 = vpack.c.bf16 %v1259_v21, %v1257_v20 }
 0x2c5   : > { %v1298_v25 = vpack.c.bf16 %v1260_v23, %v1258_v22  ;;  %v1180_v26 = vpop.f32.mrb[52].mxu1 }
 0x2c6   : > { %v1181_v27 = vadd.f32 %v1180_v26, %v3370_v44  ;;  %v1182_v28 = vpop.f32.mrb[53].mxu1 }
 0x2c7   : > { %v1183_v29 = vadd.f32 %v1182_v28, %v3373_v61  ;;  %v1184_v30 = vpop.f32.mrb[54].mxu1  ;;  %1663 = vmatprep.mubr.bf16.mxu0 %v1298_v25 }
 0x2c8   : > { %v1185_v31 = vadd.f32 %v1184_v30, %v3370_v44  ;;  %v1186_v32 = vpop.f32.mrb[55].mxu1  ;;  %1664 = vmatmul.mubr.bf16.gmra.mrb[112].mxu0 %v1297_v24  ;;  %v1261_v34 = vmax.f32 %v1181_v27, 0.0 }
 0x2c9   : > { %v1187_v33 = vadd.f32 %v1186_v32, %v3373_v61  ;;  %v1262_v36 = vmax.f32 %v1183_v29, 0.0 }
 0x2ca   : > { %v1263_v35 = vmax.f32 %v1185_v31, 0.0 }
 0x2cb   : > { %v1264_v37 = vmax.f32 %v1187_v33, 0.0 }
 0x2cc   : > { %v1299_v39 = vpack.c.bf16 %v1263_v35, %v1261_v34 }
 0x2cd   : > { %v1300_v41 = vpack.c.bf16 %v1264_v37, %v1262_v36  ;;  %v1190_v42 = vpop.f32.mrb[56].mxu1 }
 0x2ce   : > { %v1191_v45 = vadd.f32 %v1190_v42, %v3370_v44  ;;  %v1192_v46 = vpop.f32.mrb[57].mxu1 }
 0x2cf   : > { %v1193_v47 = vadd.f32 %v1192_v46, %v3373_v61  ;;  %v1194_v48 = vpop.f32.mrb[58].mxu1  ;;  %1673 = vmatprep.mubr.bf16.mxu0 %v1300_v41 }
 0x2d0   : > { %v1195_v49 = vadd.f32 %v1194_v48, %v3370_v44  ;;  %v1196_v50 = vpop.f32.mrb[59].mxu1  ;;  %1674 = vmatmul.mubr.bf16.gmra.mrb[116].mxu0 %v1299_v39  ;;  %v1265_v52 = vmax.f32 %v1191_v45, 0.0 }
 0x2d1   : > { %v1197_v51 = vadd.f32 %v1196_v50, %v3373_v61  ;;  %v1266_v54 = vmax.f32 %v1193_v47, 0.0 }
 0x2d2   : > { %v1267_v53 = vmax.f32 %v1195_v49, 0.0 }
 0x2d3   : > { %v1268_v55 = vmax.f32 %v1197_v51, 0.0 }
 0x2d4   : > { %v1301_v56 = vpack.c.bf16 %v1267_v53, %v1265_v52 }
 0x2d5   : > { %v1302_v57 = vpack.c.bf16 %v1268_v55, %v1266_v54  ;;  %v1200_v58 = vpop.f32.mrb[60].mxu1 }
 0x2d6   : > { %v1201_v43 = vadd.f32 %v1200_v58, %v3370_v44  ;;  %v1202_v59 = vpop.f32.mrb[61].mxu1 }
 0x2d7   : > { %v1203_v60 = vadd.f32 %v1202_v59, %v3373_v61  ;;  %v1204_v62 = vpop.f32.mrb[62].mxu1  ;;  %1683 = vmatprep.mubr.bf16.mxu0 %v1302_v57 }
 0x2d8   : > { %v1205_v63 = vadd.f32 %v1204_v62, %v3370_v44  ;;  %v1206_v0 = vpop.f32.mrb[63].mxu1  ;;  %1684 = vmatmul.mubr.bf16.gmra.mrb[120].mxu0 %v1301_v56  ;;  %v1269_v2 = vmax.f32 %v1201_v43, 0.0 }
 0x2d9   : > { %v1207_v1 = vadd.f32 %v1206_v0, %v3373_v61  ;;  %v1270_v4 = vmax.f32 %v1203_v60, 0.0 }
 0x2da   : > { %v1271_v3 = vmax.f32 %v1205_v63, 0.0 }
 0x2db   : > { %v1272_v5 = vmax.f32 %v1207_v1, 0.0 }
 0x2dc   : > { %v1303_v6 = vpack.c.bf16 %v1271_v3, %v1269_v2 }
 0x2dd   : > { %v1304_v7 = vpack.c.bf16 %v1272_v5, %v1270_v4 }
 0x2df   : > { %1693 = vmatprep.mubr.bf16.mxu0 %v1304_v7 }
 0x2e0   : > { %1694 = vmatmul.mubr.bf16.gmra.mrb[124].mxu0 %v1303_v6 }
 0x33b   : > { %v1545_v44 = vpop.f32.mrb[64].mxu0 }
 0x33c   : > { %v1546_v11 = vadd.f32 %v1545_v44, %v3440_v9  ;;  %v1547_v12 = vpop.f32.mrb[65].mxu0 }
 0x33d   : > { %v1548_v61 = vadd.f32 %v1547_v12, %v3443_v10  ;;  %v1549_v13 = vpop.f32.mrb[66].mxu0 }
 0x33e   : > { %v1550_v14 = vadd.f32 %v1549_v13, %v3440_v9  ;;  %v1551_v15 = vpop.f32.mrb[67].mxu0  ;;  %v1704_v17 = vmax.f32 %v1546_v11, 0.0 }
 0x33f   : > { %v1552_v16 = vadd.f32 %v1551_v15, %v3443_v10  ;;  %v1705_v19 = vmax.f32 %v1548_v61, 0.0 }
 0x340   : > { %v1706_v18 = vmax.f32 %v1550_v14, 0.0 }
 0x341   : > { %v1707_v20 = vmax.f32 %v1552_v16, 0.0 }
 0x342   : > { %v1768_v21 = vpack.c.bf16 %v1706_v18, %v1704_v17 }
 0x343   : > { %v1769_v22 = vpack.c.bf16 %v1707_v20, %v1705_v19  ;;  %v1555_v23 = vpop.f32.mrb[68].mxu0 }
 0x344   : > { %v1556_v24 = vadd.f32 %v1555_v23, %v3440_v9  ;;  %v1557_v25 = vpop.f32.mrb[69].mxu0 }
 0x345   : > { %v1558_v26 = vadd.f32 %v1557_v25, %v3443_v10  ;;  %v1559_v27 = vpop.f32.mrb[70].mxu0  ;;  %2038 = vmatprep.mubr.bf16.mxu1 %v1769_v22 }
 0x346   : > { %v1560_v28 = vadd.f32 %v1559_v27, %v3440_v9  ;;  %v1561_v29 = vpop.f32.mrb[71].mxu0  ;;  %2039 = vmatmul.mubr.bf16.vlgmr.msra.gmra.mrb[64].mxu1 %v1768_v21  ;;  %v1708_v31 = vmax.f32 %v1556_v24, 0.0 }
 0x347   : > { %v1562_v30 = vadd.f32 %v1561_v29, %v3443_v10  ;;  %v1709_v33 = vmax.f32 %v1558_v26, 0.0 }
 0x348   : > { %v1710_v32 = vmax.f32 %v1560_v28, 0.0 }
 0x349   : > { %v1711_v34 = vmax.f32 %v1562_v30, 0.0 }
 0x34a   : > { %v1770_v35 = vpack.c.bf16 %v1710_v32, %v1708_v31 }
 0x34b   : > { %v1771_v36 = vpack.c.bf16 %v1711_v34, %v1709_v33  ;;  %v1565_v37 = vpop.f32.mrb[72].mxu0 }
 0x34c   : > { %v1566_v39 = vadd.f32 %v1565_v37, %v3440_v9  ;;  %v1567_v41 = vpop.f32.mrb[73].mxu0 }
 0x34d   : > { %v1568_v42 = vadd.f32 %v1567_v41, %v3443_v10  ;;  %v1569_v45 = vpop.f32.mrb[74].mxu0  ;;  %2048 = vmatprep.mubr.bf16.mxu1 %v1771_v36 }
 0x34e   : > { %v1570_v46 = vadd.f32 %v1569_v45, %v3440_v9  ;;  %v1571_v47 = vpop.f32.mrb[75].mxu0  ;;  %2049 = vmatmul.mubr.bf16.gmra.mrb[68].mxu1 %v1770_v35  ;;  %v1712_v49 = vmax.f32 %v1566_v39, 0.0 }
 0x34f   : > { %v1572_v48 = vadd.f32 %v1571_v47, %v3443_v10  ;;  %v1713_v51 = vmax.f32 %v1568_v42, 0.0 }
 0x350   : > { %v1714_v50 = vmax.f32 %v1570_v46, 0.0 }
 0x351   : > { %v1715_v52 = vmax.f32 %v1572_v48, 0.0 }
 0x352   : > { %v1772_v53 = vpack.c.bf16 %v1714_v50, %v1712_v49 }
 0x353   : > { %v1773_v54 = vpack.c.bf16 %v1715_v52, %v1713_v51  ;;  %v1575_v55 = vpop.f32.mrb[76].mxu0 }
 0x354   : > { %v1576_v56 = vadd.f32 %v1575_v55, %v3440_v9  ;;  %v1577_v57 = vpop.f32.mrb[77].mxu0 }
 0x355   : > { %v1578_v58 = vadd.f32 %v1577_v57, %v3443_v10  ;;  %v1579_v43 = vpop.f32.mrb[78].mxu0  ;;  %2058 = vmatprep.mubr.bf16.mxu1 %v1773_v54 }
 0x356   : > { %v1580_v59 = vadd.f32 %v1579_v43, %v3440_v9  ;;  %v1581_v60 = vpop.f32.mrb[79].mxu0  ;;  %2059 = vmatmul.mubr.bf16.gmra.mrb[72].mxu1 %v1772_v53  ;;  %v1716_v63 = vmax.f32 %v1576_v56, 0.0 }
 0x357   : > { %v1582_v62 = vadd.f32 %v1581_v60, %v3443_v10  ;;  %v1717_v1 = vmax.f32 %v1578_v58, 0.0 }
 0x358   : > { %v1718_v0 = vmax.f32 %v1580_v59, 0.0 }
 0x359   : > { %v1719_v2 = vmax.f32 %v1582_v62, 0.0 }
 0x35a   : > { %v1774_v3 = vpack.c.bf16 %v1718_v0, %v1716_v63 }
 0x35b   : > { %v1775_v4 = vpack.c.bf16 %v1719_v2, %v1717_v1  ;;  %v1585_v5 = vpop.f32.mrb[80].mxu0 }
 0x35c   : > { %v1586_v6 = vadd.f32 %v1585_v5, %v3440_v9  ;;  %v1587_v7 = vpop.f32.mrb[81].mxu0 }
 0x35d   : > { %v1588_v8 = vadd.f32 %v1587_v7, %v3443_v10  ;;  %v1589_v44 = vpop.f32.mrb[82].mxu0  ;;  %2068 = vmatprep.mubr.bf16.mxu1 %v1775_v4 }
 0x35e   : > { %v1590_v11 = vadd.f32 %v1589_v44, %v3440_v9  ;;  %v1591_v12 = vpop.f32.mrb[83].mxu0  ;;  %2069 = vmatmul.mubr.bf16.gmra.mrb[76].mxu1 %v1774_v3  ;;  %v1720_v13 = vmax.f32 %v1586_v6, 0.0 }
 0x35f   : > { %v1592_v61 = vadd.f32 %v1591_v12, %v3443_v10  ;;  %v1721_v15 = vmax.f32 %v1588_v8, 0.0 }
 0x360   : > { %v1722_v14 = vmax.f32 %v1590_v11, 0.0 }
 0x361   : > { %v1723_v16 = vmax.f32 %v1592_v61, 0.0 }
 0x362   : > { %v1776_v17 = vpack.c.bf16 %v1722_v14, %v1720_v13 }
 0x363   : > { %v1777_v18 = vpack.c.bf16 %v1723_v16, %v1721_v15  ;;  %v1595_v19 = vpop.f32.mrb[84].mxu0 }
 0x364   : > { %v1596_v20 = vadd.f32 %v1595_v19, %v3440_v9  ;;  %v1597_v21 = vpop.f32.mrb[85].mxu0 }
 0x365   : > { %v1598_v22 = vadd.f32 %v1597_v21, %v3443_v10  ;;  %v1599_v23 = vpop.f32.mrb[86].mxu0  ;;  %2078 = vmatprep.mubr.bf16.mxu1 %v1777_v18 }
 0x366   : > { %v1600_v24 = vadd.f32 %v1599_v23, %v3440_v9  ;;  %v1601_v25 = vpop.f32.mrb[87].mxu0  ;;  %2079 = vmatmul.mubr.bf16.gmra.mrb[80].mxu1 %v1776_v17  ;;  %v1724_v27 = vmax.f32 %v1596_v20, 0.0 }
 0x367   : > { %v1602_v26 = vadd.f32 %v1601_v25, %v3443_v10  ;;  %v1725_v29 = vmax.f32 %v1598_v22, 0.0 }
 0x368   : > { %v1726_v28 = vmax.f32 %v1600_v24, 0.0 }
 0x369   : > { %v1727_v30 = vmax.f32 %v1602_v26, 0.0 }
 0x36a   : > { %v1778_v31 = vpack.c.bf16 %v1726_v28, %v1724_v27 }
 0x36b   : > { %v1779_v32 = vpack.c.bf16 %v1727_v30, %v1725_v29  ;;  %v1605_v33 = vpop.f32.mrb[88].mxu0 }
 0x36c   : > { %v1606_v34 = vadd.f32 %v1605_v33, %v3440_v9  ;;  %v1607_v35 = vpop.f32.mrb[89].mxu0 }
 0x36d   : > { %v1608_v36 = vadd.f32 %v1607_v35, %v3443_v10  ;;  %v1609_v37 = vpop.f32.mrb[90].mxu0  ;;  %2088 = vmatprep.mubr.bf16.mxu1 %v1779_v32 }
 0x36e   : > { %v1610_v39 = vadd.f32 %v1609_v37, %v3440_v9  ;;  %v1611_v41 = vpop.f32.mrb[91].mxu0  ;;  %2089 = vmatmul.mubr.bf16.gmra.mrb[84].mxu1 %v1778_v31  ;;  %v1728_v45 = vmax.f32 %v1606_v34, 0.0 }
 0x36f   : > { %v1612_v42 = vadd.f32 %v1611_v41, %v3443_v10  ;;  %v1729_v47 = vmax.f32 %v1608_v36, 0.0 }
 0x370   : > { %v1730_v46 = vmax.f32 %v1610_v39, 0.0 }
 0x371   : > { %v1731_v48 = vmax.f32 %v1612_v42, 0.0 }
 0x372   : > { %v1780_v49 = vpack.c.bf16 %v1730_v46, %v1728_v45 }
 0x373   : > { %v1781_v50 = vpack.c.bf16 %v1731_v48, %v1729_v47  ;;  %v1615_v51 = vpop.f32.mrb[92].mxu0 }
 0x374   : > { %v1616_v52 = vadd.f32 %v1615_v51, %v3440_v9  ;;  %v1617_v53 = vpop.f32.mrb[93].mxu0 }
 0x375   : > { %v1618_v54 = vadd.f32 %v1617_v53, %v3443_v10  ;;  %v1619_v55 = vpop.f32.mrb[94].mxu0  ;;  %2098 = vmatprep.mubr.bf16.mxu1 %v1781_v50 }
 0x376   : > { %v1620_v56 = vadd.f32 %v1619_v55, %v3440_v9  ;;  %v1621_v57 = vpop.f32.mrb[95].mxu0  ;;  %2099 = vmatmul.mubr.bf16.gmra.mrb[88].mxu1 %v1780_v49  ;;  %v1732_v43 = vmax.f32 %v1616_v52, 0.0 }
 0x377   : > { %v1622_v58 = vadd.f32 %v1621_v57, %v3443_v10  ;;  %v1733_v60 = vmax.f32 %v1618_v54, 0.0 }
 0x378   : > { %v1734_v59 = vmax.f32 %v1620_v56, 0.0 }
 0x379   : > { %v1735_v62 = vmax.f32 %v1622_v58, 0.0 }
 0x37a   : > { %v1782_v63 = vpack.c.bf16 %v1734_v59, %v1732_v43 }
 0x37b   : > { %v1783_v0 = vpack.c.bf16 %v1735_v62, %v1733_v60  ;;  %v1625_v1 = vpop.f32.mrb[96].mxu0 }
 0x37c   : > { %v1626_v2 = vadd.f32 %v1625_v1, %v3440_v9  ;;  %v1627_v3 = vpop.f32.mrb[97].mxu0 }
 0x37d   : > { %v1628_v4 = vadd.f32 %v1627_v3, %v3443_v10  ;;  %v1629_v5 = vpop.f32.mrb[98].mxu0  ;;  %2108 = vmatprep.mubr.bf16.mxu1 %v1783_v0 }
 0x37e   : > { %v1630_v6 = vadd.f32 %v1629_v5, %v3440_v9  ;;  %v1631_v7 = vpop.f32.mrb[99].mxu0  ;;  %2109 = vmatmul.mubr.bf16.gmra.mrb[92].mxu1 %v1782_v63  ;;  %v1736_v44 = vmax.f32 %v1626_v2, 0.0 }
 0x37f   : > { %v1632_v8 = vadd.f32 %v1631_v7, %v3443_v10  ;;  %v1737_v12 = vmax.f32 %v1628_v4, 0.0 }
 0x380   : > { %v1738_v11 = vmax.f32 %v1630_v6, 0.0 }
 0x381   : > { %v1739_v61 = vmax.f32 %v1632_v8, 0.0 }
 0x382   : > { %v1784_v13 = vpack.c.bf16 %v1738_v11, %v1736_v44 }
 0x383   : > { %v1785_v14 = vpack.c.bf16 %v1739_v61, %v1737_v12  ;;  %v1635_v15 = vpop.f32.mrb[100].mxu0 }
 0x384   : > { %v1636_v16 = vadd.f32 %v1635_v15, %v3440_v9  ;;  %v1637_v17 = vpop.f32.mrb[101].mxu0 }
 0x385   : > { %v1638_v18 = vadd.f32 %v1637_v17, %v3443_v10  ;;  %v1639_v19 = vpop.f32.mrb[102].mxu0  ;;  %2118 = vmatprep.mubr.bf16.mxu1 %v1785_v14 }
 0x386   : > { %v1640_v20 = vadd.f32 %v1639_v19, %v3440_v9  ;;  %v1641_v21 = vpop.f32.mrb[103].mxu0  ;;  %2119 = vmatmul.mubr.bf16.gmra.mrb[96].mxu1 %v1784_v13  ;;  %v1740_v23 = vmax.f32 %v1636_v16, 0.0 }
 0x387   : > { %v1642_v22 = vadd.f32 %v1641_v21, %v3443_v10  ;;  %v1741_v25 = vmax.f32 %v1638_v18, 0.0 }
 0x388   : > { %v1742_v24 = vmax.f32 %v1640_v20, 0.0 }
 0x389   : > { %v1743_v26 = vmax.f32 %v1642_v22, 0.0 }
 0x38a   : > { %v1786_v27 = vpack.c.bf16 %v1742_v24, %v1740_v23 }
 0x38b   : > { %v1787_v28 = vpack.c.bf16 %v1743_v26, %v1741_v25  ;;  %v1645_v29 = vpop.f32.mrb[104].mxu0 }
 0x38c   : > { %v1646_v30 = vadd.f32 %v1645_v29, %v3440_v9  ;;  %v1647_v31 = vpop.f32.mrb[105].mxu0 }
 0x38d   : > { %v1648_v32 = vadd.f32 %v1647_v31, %v3443_v10  ;;  %v1649_v33 = vpop.f32.mrb[106].mxu0  ;;  %2128 = vmatprep.mubr.bf16.mxu1 %v1787_v28 }
 0x38e   : > { %v1650_v34 = vadd.f32 %v1649_v33, %v3440_v9  ;;  %v1651_v35 = vpop.f32.mrb[107].mxu0  ;;  %2129 = vmatmul.mubr.bf16.gmra.mrb[100].mxu1 %v1786_v27  ;;  %v1744_v37 = vmax.f32 %v1646_v30, 0.0 }
 0x38f   : > { %v1652_v36 = vadd.f32 %v1651_v35, %v3443_v10  ;;  %v1745_v41 = vmax.f32 %v1648_v32, 0.0 }
 0x390   : > { %v1746_v39 = vmax.f32 %v1650_v34, 0.0 }
 0x391   : > { %v1747_v42 = vmax.f32 %v1652_v36, 0.0 }
 0x392   : > { %v1788_v45 = vpack.c.bf16 %v1746_v39, %v1744_v37 }
 0x393   : > { %v1789_v46 = vpack.c.bf16 %v1747_v42, %v1745_v41  ;;  %v1655_v47 = vpop.f32.mrb[108].mxu0 }
 0x394   : > { %v1656_v48 = vadd.f32 %v1655_v47, %v3440_v9  ;;  %v1657_v49 = vpop.f32.mrb[109].mxu0 }
 0x395   : > { %v1658_v50 = vadd.f32 %v1657_v49, %v3443_v10  ;;  %v1659_v51 = vpop.f32.mrb[110].mxu0  ;;  %2138 = vmatprep.mubr.bf16.mxu1 %v1789_v46 }
 0x396   : > { %v1660_v52 = vadd.f32 %v1659_v51, %v3440_v9  ;;  %v1661_v53 = vpop.f32.mrb[111].mxu0  ;;  %2139 = vmatmul.mubr.bf16.gmra.mrb[104].mxu1 %v1788_v45  ;;  %v1748_v55 = vmax.f32 %v1656_v48, 0.0 }
 0x397   : > { %v1662_v54 = vadd.f32 %v1661_v53, %v3443_v10  ;;  %v1749_v57 = vmax.f32 %v1658_v50, 0.0 }
 0x398   : > { %v1750_v56 = vmax.f32 %v1660_v52, 0.0 }
 0x399   : > { %v1751_v58 = vmax.f32 %v1662_v54, 0.0 }
 0x39a   : > { %v1790_v43 = vpack.c.bf16 %v1750_v56, %v1748_v55 }
 0x39b   : > { %v1791_v59 = vpack.c.bf16 %v1751_v58, %v1749_v57  ;;  %v1665_v60 = vpop.f32.mrb[112].mxu0  ;;  %v1834_v57 = vld [vmem:[#allocation7 + $0x6] sm:$0x3] }
 0x39c   : > { %v1666_v62 = vadd.f32 %v1665_v60, %v3440_v9  ;;  %v1667_v63 = vpop.f32.mrb[113].mxu0  ;;  %v3510_v58 = vrot.slane %v1834_v57, %v3295_v38 }
 0x39d   : > { %v1668_v0 = vadd.f32 %v1667_v63, %v3443_v10  ;;  %v1669_v1 = vpop.f32.mrb[114].mxu0  ;;  %2148 = vmatprep.mubr.bf16.mxu1 %v1791_v59 }
 0x39e   : > { %v1670_v2 = vadd.f32 %v1669_v1, %v3440_v9  ;;  %v1671_v3 = vpop.f32.mrb[115].mxu0  ;;  %2149 = vmatmul.mubr.bf16.gmra.mrb[108].mxu1 %v1790_v43  ;;  %v1752_v5 = vmax.f32 %v1666_v62, 0.0  ;;  %v3513_v43 = vrot.slane %v1834_v57, %v3297_v40 }
 0x39f   : > { %v1672_v4 = vadd.f32 %v1671_v3, %v3443_v10  ;;  %v1753_v7 = vmax.f32 %v1668_v0, 0.0 }
 0x3a0   : > { %v1754_v6 = vmax.f32 %v1670_v2, 0.0 }
 0x3a1   : > { %v1755_v8 = vmax.f32 %v1672_v4, 0.0 }
 0x3a2   : > { %v1792_v44 = vpack.c.bf16 %v1754_v6, %v1752_v5 }
 0x3a3   : > { %v1793_v11 = vpack.c.bf16 %v1755_v8, %v1753_v7  ;;  %v1675_v12 = vpop.f32.mrb[116].mxu0 }
 0x3a4   : > { %v1676_v61 = vadd.f32 %v1675_v12, %v3440_v9  ;;  %v1677_v13 = vpop.f32.mrb[117].mxu0 }
 0x3a5   : > { %v1678_v14 = vadd.f32 %v1677_v13, %v3443_v10  ;;  %v1679_v15 = vpop.f32.mrb[118].mxu0  ;;  %2158 = vmatprep.mubr.bf16.mxu1 %v1793_v11 }
 0x3a6   : > { %v1680_v16 = vadd.f32 %v1679_v15, %v3440_v9  ;;  %v1681_v17 = vpop.f32.mrb[119].mxu0  ;;  %2159 = vmatmul.mubr.bf16.gmra.mrb[112].mxu1 %v1792_v44  ;;  %v1756_v19 = vmax.f32 %v1676_v61, 0.0 }
 0x3a7   : > { %v1682_v18 = vadd.f32 %v1681_v17, %v3443_v10  ;;  %v1757_v21 = vmax.f32 %v1678_v14, 0.0 }
 0x3a8   : > { %v1758_v20 = vmax.f32 %v1680_v16, 0.0 }
 0x3a9   : > { %v1759_v22 = vmax.f32 %v1682_v18, 0.0 }
 0x3aa   : > { %v1794_v23 = vpack.c.bf16 %v1758_v20, %v1756_v19 }
 0x3ab   : > { %v1795_v24 = vpack.c.bf16 %v1759_v22, %v1757_v21  ;;  %v1685_v25 = vpop.f32.mrb[120].mxu0 }
 0x3ac   : > { %v1686_v26 = vadd.f32 %v1685_v25, %v3440_v9  ;;  %v1687_v27 = vpop.f32.mrb[121].mxu0 }
 0x3ad   : > { %v1688_v28 = vadd.f32 %v1687_v27, %v3443_v10  ;;  %v1689_v29 = vpop.f32.mrb[122].mxu0  ;;  %2168 = vmatprep.mubr.bf16.mxu1 %v1795_v24 }
 0x3ae   : > { %v1690_v30 = vadd.f32 %v1689_v29, %v3440_v9  ;;  %v1691_v31 = vpop.f32.mrb[123].mxu0  ;;  %2169 = vmatmul.mubr.bf16.gmra.mrb[116].mxu1 %v1794_v23  ;;  %v1760_v33 = vmax.f32 %v1686_v26, 0.0 }
 0x3af   : > { %v1692_v32 = vadd.f32 %v1691_v31, %v3443_v10  ;;  %v1761_v35 = vmax.f32 %v1688_v28, 0.0 }
 0x3b0   : > { %v1762_v34 = vmax.f32 %v1690_v30, 0.0 }
 0x3b1   : > { %v1763_v36 = vmax.f32 %v1692_v32, 0.0 }
 0x3b2   : > { %v1796_v37 = vpack.c.bf16 %v1762_v34, %v1760_v33 }
 0x3b3   : > { %v1797_v39 = vpack.c.bf16 %v1763_v36, %v1761_v35  ;;  %v1695_v41 = vpop.f32.mrb[124].mxu0 }
 0x3b4   : > { %v1696_v42 = vadd.f32 %v1695_v41, %v3440_v9  ;;  %v1697_v45 = vpop.f32.mrb[125].mxu0 }
 0x3b5   : > { %v1698_v46 = vadd.f32 %v1697_v45, %v3443_v10  ;;  %v1699_v47 = vpop.f32.mrb[126].mxu0  ;;  %2178 = vmatprep.mubr.bf16.mxu1 %v1797_v39 }
 0x3b6   : > { %v1700_v48 = vadd.f32 %v1699_v47, %v3440_v9  ;;  %v1701_v49 = vpop.f32.mrb[127].mxu0  ;;  %2179 = vmatmul.mubr.bf16.gmra.mrb[120].mxu1 %v1796_v37  ;;  %v1764_v51 = vmax.f32 %v1696_v42, 0.0 }
 0x3b7   : > { %v1702_v50 = vadd.f32 %v1701_v49, %v3443_v10  ;;  %v1765_v53 = vmax.f32 %v1698_v46, 0.0 }
 0x3b8   : > { %v1766_v52 = vmax.f32 %v1700_v48, 0.0 }
 0x3b9   : > { %v1767_v54 = vmax.f32 %v1702_v50, 0.0 }
 0x3ba   : > { %v1798_v55 = vpack.c.bf16 %v1766_v52, %v1764_v51 }
 0x3bb   : > { %v1799_v56 = vpack.c.bf16 %v1767_v54, %v1765_v53 }
 0x3bd   : > { %2188 = vmatprep.mubr.bf16.mxu1 %v1799_v56 }
 0x3be   : > { %2189 = vmatmul.mubr.bf16.gmra.mrb[124].mxu1 %v1798_v55 }
 0x419   : > { %v2040_v9 = vpop.f32.mrb[64].mxu1 }
 0x41a   : > { %v2041_v59 = vadd.f32 %v2040_v9, %v3510_v58  ;;  %v2042_v10 = vpop.f32.mrb[65].mxu1 }
 0x41b   : > { %v2043_v60 = vadd.f32 %v2042_v10, %v3513_v43  ;;  %v2044_v62 = vpop.f32.mrb[66].mxu1 }
 0x41c   : > { %v2199_v63 = vmax.f32 %v2041_v59, 0.0  ;;  %v2045_v0 = vadd.f32 %v2044_v62, %v3510_v58  ;;  %v2046_v1 = vpop.f32.mrb[67].mxu1 }
 0x41d   : > { %v2200_v2 = vmax.f32 %v2043_v60, 0.0  ;;  %v2047_v3 = vadd.f32 %v2046_v1, %v3513_v43 }
 0x41e   : > { %2263 = vst [vmem:[%s3521_s18] sm:$0xff] %v2199_v63  ;;  %v2201_v38 = vmax.f32 %v2045_v0, 0.0 }
 0x41f   : > { %2264 = vst [vmem:[%s3521_s18 + $0x8] sm:$0xff] %v2200_v2  ;;  %v2202_v40 = vmax.f32 %v2047_v3, 0.0 }
 0x420   : > { %2265 = vst [vmem:[%s3521_s18 + $0x10] sm:$0xff] %v2201_v38 }
 0x421   : > { %2266 = vst [vmem:[%s3521_s18 + $0x18] sm:$0xff] %v2202_v40  ;;  %v2050_v4 = vpop.f32.mrb[68].mxu1 }
 0x422   : > { %v2051_v5 = vadd.f32 %v2050_v4, %v3510_v58  ;;  %v2052_v6 = vpop.f32.mrb[69].mxu1 }
 0x423   : > { %v2053_v7 = vadd.f32 %v2052_v6, %v3513_v43  ;;  %v2054_v8 = vpop.f32.mrb[70].mxu1 }
 0x424   : > { %v2203_v44 = vmax.f32 %v2051_v5, 0.0  ;;  %v2055_v11 = vadd.f32 %v2054_v8, %v3510_v58  ;;  %v2056_v12 = vpop.f32.mrb[71].mxu1 }
 0x425   : > { %v2204_v61 = vmax.f32 %v2053_v7, 0.0  ;;  %v2057_v13 = vadd.f32 %v2056_v12, %v3513_v43 }
 0x426   : > { %2267 = vst [vmem:[%s3521_s18 + $0x20] sm:$0xff] %v2203_v44  ;;  %v2205_v14 = vmax.f32 %v2055_v11, 0.0 }
 0x427   : > { %2268 = vst [vmem:[%s3521_s18 + $0x28] sm:$0xff] %v2204_v61  ;;  %v2206_v15 = vmax.f32 %v2057_v13, 0.0 }
 0x428   : > { %2269 = vst [vmem:[%s3521_s18 + $0x30] sm:$0xff] %v2205_v14 }
 0x429   : > { %2270 = vst [vmem:[%s3521_s18 + $0x38] sm:$0xff] %v2206_v15  ;;  %v2060_v16 = vpop.f32.mrb[72].mxu1 }
 0x42a   : > { %v2061_v17 = vadd.f32 %v2060_v16, %v3510_v58  ;;  %v2062_v18 = vpop.f32.mrb[73].mxu1 }
 0x42b   : > { %v2063_v19 = vadd.f32 %v2062_v18, %v3513_v43  ;;  %v2064_v20 = vpop.f32.mrb[74].mxu1 }
 0x42c   : > { %v2207_v21 = vmax.f32 %v2061_v17, 0.0  ;;  %v2065_v22 = vadd.f32 %v2064_v20, %v3510_v58  ;;  %v2066_v23 = vpop.f32.mrb[75].mxu1 }
 0x42d   : > { %v2208_v24 = vmax.f32 %v2063_v19, 0.0  ;;  %v2067_v25 = vadd.f32 %v2066_v23, %v3513_v43 }
 0x42e   : > { %2271 = vst [vmem:[%s3521_s18 + $0x40] sm:$0xff] %v2207_v21  ;;  %v2209_v26 = vmax.f32 %v2065_v22, 0.0 }
 0x42f   : > { %2272 = vst [vmem:[%s3521_s18 + $0x48] sm:$0xff] %v2208_v24  ;;  %v2210_v27 = vmax.f32 %v2067_v25, 0.0 }
 0x430   : > { %2273 = vst [vmem:[%s3521_s18 + $0x50] sm:$0xff] %v2209_v26 }
 0x431   : > { %2274 = vst [vmem:[%s3521_s18 + $0x58] sm:$0xff] %v2210_v27  ;;  %v2070_v28 = vpop.f32.mrb[76].mxu1 }
 0x432   : > { %v2071_v29 = vadd.f32 %v2070_v28, %v3510_v58  ;;  %v2072_v30 = vpop.f32.mrb[77].mxu1 }
 0x433   : > { %v2073_v31 = vadd.f32 %v2072_v30, %v3513_v43  ;;  %v2074_v32 = vpop.f32.mrb[78].mxu1 }
 0x434   : > { %v2211_v33 = vmax.f32 %v2071_v29, 0.0  ;;  %v2075_v34 = vadd.f32 %v2074_v32, %v3510_v58  ;;  %v2076_v35 = vpop.f32.mrb[79].mxu1 }
 0x435   : > { %v2212_v36 = vmax.f32 %v2073_v31, 0.0  ;;  %v2077_v37 = vadd.f32 %v2076_v35, %v3513_v43 }
 0x436   : > { %2275 = vst [vmem:[%s3521_s18 + $0x60] sm:$0xff] %v2211_v33  ;;  %v2213_v39 = vmax.f32 %v2075_v34, 0.0 }
 0x437   : > { %2276 = vst [vmem:[%s3521_s18 + $0x68] sm:$0xff] %v2212_v36  ;;  %v2214_v41 = vmax.f32 %v2077_v37, 0.0 }
 0x438   : > { %2277 = vst [vmem:[%s3521_s18 + $0x70] sm:$0xff] %v2213_v39 }
 0x439   : > { %2278 = vst [vmem:[%s3521_s18 + $0x78] sm:$0xff] %v2214_v41  ;;  %v2080_v42 = vpop.f32.mrb[80].mxu1 }
 0x43a   : > { %v2081_v45 = vadd.f32 %v2080_v42, %v3510_v58  ;;  %v2082_v46 = vpop.f32.mrb[81].mxu1 }
 0x43b   : > { %v2083_v47 = vadd.f32 %v2082_v46, %v3513_v43  ;;  %v2084_v48 = vpop.f32.mrb[82].mxu1 }
 0x43c   : > { %v2215_v49 = vmax.f32 %v2081_v45, 0.0  ;;  %v2085_v50 = vadd.f32 %v2084_v48, %v3510_v58  ;;  %v2086_v51 = vpop.f32.mrb[83].mxu1 }
 0x43d   : > { %v2216_v52 = vmax.f32 %v2083_v47, 0.0  ;;  %v2087_v53 = vadd.f32 %v2086_v51, %v3513_v43 }
 0x43e   : > { %2279 = vst [vmem:[%s3521_s18 + $0x80] sm:$0xff] %v2215_v49  ;;  %v2217_v54 = vmax.f32 %v2085_v50, 0.0 }
 0x43f   : > { %2280 = vst [vmem:[%s3521_s18 + $0x88] sm:$0xff] %v2216_v52  ;;  %v2218_v55 = vmax.f32 %v2087_v53, 0.0 }
 0x440   : > { %2281 = vst [vmem:[%s3521_s18 + $0x90] sm:$0xff] %v2217_v54 }
 0x441   : > { %2282 = vst [vmem:[%s3521_s18 + $0x98] sm:$0xff] %v2218_v55  ;;  %v2090_v56 = vpop.f32.mrb[84].mxu1 }
 0x442   : > { %v2091_v57 = vadd.f32 %v2090_v56, %v3510_v58  ;;  %v2092_v9 = vpop.f32.mrb[85].mxu1 }
 0x443   : > { %v2093_v59 = vadd.f32 %v2092_v9, %v3513_v43  ;;  %v2094_v10 = vpop.f32.mrb[86].mxu1 }
 0x444   : > { %v2219_v60 = vmax.f32 %v2091_v57, 0.0  ;;  %v2095_v62 = vadd.f32 %v2094_v10, %v3510_v58  ;;  %v2096_v63 = vpop.f32.mrb[87].mxu1 }
 0x445   : > { %v2220_v0 = vmax.f32 %v2093_v59, 0.0  ;;  %v2097_v1 = vadd.f32 %v2096_v63, %v3513_v43 }
 0x446   : > { %2283 = vst [vmem:[%s3521_s18 + $0xa0] sm:$0xff] %v2219_v60  ;;  %v2221_v2 = vmax.f32 %v2095_v62, 0.0 }
 0x447   : > { %2284 = vst [vmem:[%s3521_s18 + $0xa8] sm:$0xff] %v2220_v0  ;;  %v2222_v3 = vmax.f32 %v2097_v1, 0.0 }
 0x448   : > { %2285 = vst [vmem:[%s3521_s18 + $0xb0] sm:$0xff] %v2221_v2 }
 0x449   : > { %2286 = vst [vmem:[%s3521_s18 + $0xb8] sm:$0xff] %v2222_v3  ;;  %v2100_v38 = vpop.f32.mrb[88].mxu1 }
 0x44a   : > { %v2101_v40 = vadd.f32 %v2100_v38, %v3510_v58  ;;  %v2102_v4 = vpop.f32.mrb[89].mxu1 }
 0x44b   : > { %v2103_v5 = vadd.f32 %v2102_v4, %v3513_v43  ;;  %v2104_v6 = vpop.f32.mrb[90].mxu1 }
 0x44c   : > { %v2223_v7 = vmax.f32 %v2101_v40, 0.0  ;;  %v2105_v8 = vadd.f32 %v2104_v6, %v3510_v58  ;;  %v2106_v44 = vpop.f32.mrb[91].mxu1 }
 0x44d   : > { %v2224_v11 = vmax.f32 %v2103_v5, 0.0  ;;  %v2107_v12 = vadd.f32 %v2106_v44, %v3513_v43 }
 0x44e   : > { %2287 = vst [vmem:[%s3521_s18 + $0xc0] sm:$0xff] %v2223_v7  ;;  %v2225_v61 = vmax.f32 %v2105_v8, 0.0 }
 0x44f   : > { %2288 = vst [vmem:[%s3521_s18 + $0xc8] sm:$0xff] %v2224_v11  ;;  %v2226_v13 = vmax.f32 %v2107_v12, 0.0 }
 0x450   : > { %2289 = vst [vmem:[%s3521_s18 + $0xd0] sm:$0xff] %v2225_v61 }
 0x451   : > { %2290 = vst [vmem:[%s3521_s18 + $0xd8] sm:$0xff] %v2226_v13  ;;  %v2110_v14 = vpop.f32.mrb[92].mxu1 }
 0x452   : > { %v2111_v15 = vadd.f32 %v2110_v14, %v3510_v58  ;;  %v2112_v16 = vpop.f32.mrb[93].mxu1 }
 0x453   : > { %v2113_v17 = vadd.f32 %v2112_v16, %v3513_v43  ;;  %v2114_v18 = vpop.f32.mrb[94].mxu1 }
 0x454   : > { %v2227_v19 = vmax.f32 %v2111_v15, 0.0  ;;  %v2115_v20 = vadd.f32 %v2114_v18, %v3510_v58  ;;  %v2116_v21 = vpop.f32.mrb[95].mxu1 }
 0x455   : > { %v2228_v22 = vmax.f32 %v2113_v17, 0.0  ;;  %v2117_v23 = vadd.f32 %v2116_v21, %v3513_v43 }
 0x456   : > { %2291 = vst [vmem:[%s3521_s18 + $0xe0] sm:$0xff] %v2227_v19  ;;  %v2229_v24 = vmax.f32 %v2115_v20, 0.0 }
 0x457   : > { %2292 = vst [vmem:[%s3521_s18 + $0xe8] sm:$0xff] %v2228_v22  ;;  %v2230_v25 = vmax.f32 %v2117_v23, 0.0 }
 0x458   : > { %2293 = vst [vmem:[%s3521_s18 + $0xf0] sm:$0xff] %v2229_v24 }
 0x459   : > { %2294 = vst [vmem:[%s3521_s18 + $0xf8] sm:$0xff] %v2230_v25  ;;  %v2120_v26 = vpop.f32.mrb[96].mxu1 }
 0x45a   : > { %v2121_v27 = vadd.f32 %v2120_v26, %v3510_v58  ;;  %v2122_v28 = vpop.f32.mrb[97].mxu1 }
 0x45b   : > { %v2123_v29 = vadd.f32 %v2122_v28, %v3513_v43  ;;  %v2124_v30 = vpop.f32.mrb[98].mxu1 }
 0x45c   : > { %v2231_v31 = vmax.f32 %v2121_v27, 0.0  ;;  %v2125_v32 = vadd.f32 %v2124_v30, %v3510_v58  ;;  %v2126_v33 = vpop.f32.mrb[99].mxu1 }
 0x45d   : > { %v2232_v34 = vmax.f32 %v2123_v29, 0.0  ;;  %v2127_v35 = vadd.f32 %v2126_v33, %v3513_v43 }
 0x45e   : > { %2295 = vst [vmem:[%s3521_s18 + $0x100] sm:$0xff] %v2231_v31  ;;  %v2233_v36 = vmax.f32 %v2125_v32, 0.0 }
 0x45f   : > { %2296 = vst [vmem:[%s3521_s18 + $0x108] sm:$0xff] %v2232_v34  ;;  %v2234_v37 = vmax.f32 %v2127_v35, 0.0 }
 0x460   : > { %2297 = vst [vmem:[%s3521_s18 + $0x110] sm:$0xff] %v2233_v36 }
 0x461   : > { %2298 = vst [vmem:[%s3521_s18 + $0x118] sm:$0xff] %v2234_v37  ;;  %v2130_v39 = vpop.f32.mrb[100].mxu1 }
 0x462   : > { %v2131_v41 = vadd.f32 %v2130_v39, %v3510_v58  ;;  %v2132_v42 = vpop.f32.mrb[101].mxu1 }
 0x463   : > { %v2133_v45 = vadd.f32 %v2132_v42, %v3513_v43  ;;  %v2134_v46 = vpop.f32.mrb[102].mxu1 }
 0x464   : > { %v2235_v47 = vmax.f32 %v2131_v41, 0.0  ;;  %v2135_v48 = vadd.f32 %v2134_v46, %v3510_v58  ;;  %v2136_v49 = vpop.f32.mrb[103].mxu1 }
 0x465   : > { %v2236_v50 = vmax.f32 %v2133_v45, 0.0  ;;  %v2137_v51 = vadd.f32 %v2136_v49, %v3513_v43 }
 0x466   : > { %2299 = vst [vmem:[%s3521_s18 + $0x120] sm:$0xff] %v2235_v47  ;;  %v2237_v52 = vmax.f32 %v2135_v48, 0.0 }
 0x467   : > { %2300 = vst [vmem:[%s3521_s18 + $0x128] sm:$0xff] %v2236_v50  ;;  %v2238_v53 = vmax.f32 %v2137_v51, 0.0 }
 0x468   : > { %2301 = vst [vmem:[%s3521_s18 + $0x130] sm:$0xff] %v2237_v52 }
 0x469   : > { %2302 = vst [vmem:[%s3521_s18 + $0x138] sm:$0xff] %v2238_v53  ;;  %v2140_v54 = vpop.f32.mrb[104].mxu1 }
 0x46a   : > { %v2141_v55 = vadd.f32 %v2140_v54, %v3510_v58  ;;  %v2142_v56 = vpop.f32.mrb[105].mxu1 }
 0x46b   : > { %v2143_v57 = vadd.f32 %v2142_v56, %v3513_v43  ;;  %v2144_v9 = vpop.f32.mrb[106].mxu1 }
 0x46c   : > { %v2239_v59 = vmax.f32 %v2141_v55, 0.0  ;;  %v2145_v10 = vadd.f32 %v2144_v9, %v3510_v58  ;;  %v2146_v60 = vpop.f32.mrb[107].mxu1 }
 0x46d   : > { %v2240_v62 = vmax.f32 %v2143_v57, 0.0  ;;  %v2147_v63 = vadd.f32 %v2146_v60, %v3513_v43 }
 0x46e   : > { %2303 = vst [vmem:[%s3521_s18 + $0x140] sm:$0xff] %v2239_v59  ;;  %v2241_v0 = vmax.f32 %v2145_v10, 0.0 }
 0x46f   : > { %2304 = vst [vmem:[%s3521_s18 + $0x148] sm:$0xff] %v2240_v62  ;;  %v2242_v1 = vmax.f32 %v2147_v63, 0.0 }
 0x470   : > { %2305 = vst [vmem:[%s3521_s18 + $0x150] sm:$0xff] %v2241_v0 }
 0x471   : > { %2306 = vst [vmem:[%s3521_s18 + $0x158] sm:$0xff] %v2242_v1  ;;  %v2150_v2 = vpop.f32.mrb[108].mxu1 }
 0x472   : > { %v2151_v3 = vadd.f32 %v2150_v2, %v3510_v58  ;;  %v2152_v38 = vpop.f32.mrb[109].mxu1 }
 0x473   : > { %v2153_v40 = vadd.f32 %v2152_v38, %v3513_v43  ;;  %v2154_v4 = vpop.f32.mrb[110].mxu1 }
 0x474   : > { %v2243_v5 = vmax.f32 %v2151_v3, 0.0  ;;  %v2155_v6 = vadd.f32 %v2154_v4, %v3510_v58  ;;  %v2156_v7 = vpop.f32.mrb[111].mxu1 }
 0x475   : > { %v2244_v8 = vmax.f32 %v2153_v40, 0.0  ;;  %v2157_v44 = vadd.f32 %v2156_v7, %v3513_v43 }
 0x476   : > { %2307 = vst [vmem:[%s3521_s18 + $0x160] sm:$0xff] %v2243_v5  ;;  %v2245_v11 = vmax.f32 %v2155_v6, 0.0 }
 0x477   : > { %2308 = vst [vmem:[%s3521_s18 + $0x168] sm:$0xff] %v2244_v8  ;;  %v2246_v12 = vmax.f32 %v2157_v44, 0.0 }
 0x478   : > { %2309 = vst [vmem:[%s3521_s18 + $0x170] sm:$0xff] %v2245_v11 }
 0x479   : > { %2310 = vst [vmem:[%s3521_s18 + $0x178] sm:$0xff] %v2246_v12  ;;  %v2160_v61 = vpop.f32.mrb[112].mxu1 }
 0x47a   : > { %v2161_v13 = vadd.f32 %v2160_v61, %v3510_v58  ;;  %v2162_v14 = vpop.f32.mrb[113].mxu1 }
 0x47b   : > { %v2163_v15 = vadd.f32 %v2162_v14, %v3513_v43  ;;  %v2164_v16 = vpop.f32.mrb[114].mxu1 }
 0x47c   : > { %v2247_v17 = vmax.f32 %v2161_v13, 0.0  ;;  %v2165_v18 = vadd.f32 %v2164_v16, %v3510_v58  ;;  %v2166_v19 = vpop.f32.mrb[115].mxu1 }
 0x47d   : > { %v2248_v20 = vmax.f32 %v2163_v15, 0.0  ;;  %v2167_v21 = vadd.f32 %v2166_v19, %v3513_v43 }
 0x47e   : > { %2311 = vst [vmem:[%s3521_s18 + $0x180] sm:$0xff] %v2247_v17  ;;  %v2249_v22 = vmax.f32 %v2165_v18, 0.0 }
 0x47f   : > { %2312 = vst [vmem:[%s3521_s18 + $0x188] sm:$0xff] %v2248_v20  ;;  %v2250_v23 = vmax.f32 %v2167_v21, 0.0 }
 0x480   : > { %2313 = vst [vmem:[%s3521_s18 + $0x190] sm:$0xff] %v2249_v22 }
 0x481   : > { %2314 = vst [vmem:[%s3521_s18 + $0x198] sm:$0xff] %v2250_v23  ;;  %v2170_v24 = vpop.f32.mrb[116].mxu1 }
 0x482   : > { %v2171_v25 = vadd.f32 %v2170_v24, %v3510_v58  ;;  %v2172_v26 = vpop.f32.mrb[117].mxu1 }
 0x483   : > { %v2173_v27 = vadd.f32 %v2172_v26, %v3513_v43  ;;  %v2174_v28 = vpop.f32.mrb[118].mxu1 }
 0x484   : > { %v2251_v29 = vmax.f32 %v2171_v25, 0.0  ;;  %v2175_v30 = vadd.f32 %v2174_v28, %v3510_v58  ;;  %v2176_v31 = vpop.f32.mrb[119].mxu1 }
 0x485   : > { %v2252_v32 = vmax.f32 %v2173_v27, 0.0  ;;  %v2177_v33 = vadd.f32 %v2176_v31, %v3513_v43 }
 0x486   : > { %2315 = vst [vmem:[%s3521_s18 + $0x1a0] sm:$0xff] %v2251_v29  ;;  %v2253_v34 = vmax.f32 %v2175_v30, 0.0 }
 0x487   : > { %2316 = vst [vmem:[%s3521_s18 + $0x1a8] sm:$0xff] %v2252_v32  ;;  %v2254_v35 = vmax.f32 %v2177_v33, 0.0 }
 0x488   : > { %2317 = vst [vmem:[%s3521_s18 + $0x1b0] sm:$0xff] %v2253_v34 }
 0x489   : > { %2318 = vst [vmem:[%s3521_s18 + $0x1b8] sm:$0xff] %v2254_v35  ;;  %v2180_v36 = vpop.f32.mrb[120].mxu1 }
 0x48a   : > { %v2181_v37 = vadd.f32 %v2180_v36, %v3510_v58  ;;  %v2182_v39 = vpop.f32.mrb[121].mxu1 }
 0x48b   : > { %v2183_v41 = vadd.f32 %v2182_v39, %v3513_v43  ;;  %v2184_v42 = vpop.f32.mrb[122].mxu1 }
 0x48c   : > { %v2255_v45 = vmax.f32 %v2181_v37, 0.0  ;;  %v2185_v46 = vadd.f32 %v2184_v42, %v3510_v58  ;;  %v2186_v47 = vpop.f32.mrb[123].mxu1 }
 0x48d   : > { %v2256_v48 = vmax.f32 %v2183_v41, 0.0  ;;  %v2187_v49 = vadd.f32 %v2186_v47, %v3513_v43 }
 0x48e   : > { %2319 = vst [vmem:[%s3521_s18 + $0x1c0] sm:$0xff] %v2255_v45  ;;  %v2257_v50 = vmax.f32 %v2185_v46, 0.0 }
 0x48f   : > { %2320 = vst [vmem:[%s3521_s18 + $0x1c8] sm:$0xff] %v2256_v48  ;;  %v2258_v51 = vmax.f32 %v2187_v49, 0.0 }
 0x490   : > { %2321 = vst [vmem:[%s3521_s18 + $0x1d0] sm:$0xff] %v2257_v50 }
 0x491   : > { %2322 = vst [vmem:[%s3521_s18 + $0x1d8] sm:$0xff] %v2258_v51  ;;  %v2190_v52 = vpop.f32.mrb[124].mxu1 }
 0x492   : > { %v2191_v53 = vadd.f32 %v2190_v52, %v3510_v58  ;;  %v2192_v54 = vpop.f32.mrb[125].mxu1 }
 0x493   : > { %v2193_v55 = vadd.f32 %v2192_v54, %v3513_v43  ;;  %v2194_v56 = vpop.f32.mrb[126].mxu1 }
 0x494   : > { %v2259_v57 = vmax.f32 %v2191_v53, 0.0  ;;  %v2195_v9 = vadd.f32 %v2194_v56, %v3510_v58  ;;  %v2196_v59 = vpop.f32.mrb[127].mxu1 }
 0x495   : > { %v2260_v10 = vmax.f32 %v2193_v55, 0.0  ;;  %v2197_v60 = vadd.f32 %v2196_v59, %v3513_v43 }
 0x496   : > { %2323 = vst [vmem:[%s3521_s18 + $0x1e0] sm:$0xff] %v2259_v57  ;;  %v2261_v62 = vmax.f32 %v2195_v9, 0.0 }
 0x497   : > { %2324 = vst [vmem:[%s3521_s18 + $0x1e8] sm:$0xff] %v2260_v10  ;;  %v2262_v63 = vmax.f32 %v2197_v60, 0.0 }
 0x498   : > { %2325 = vst [vmem:[%s3521_s18 + $0x1f0] sm:$0xff] %v2261_v62 }
 0x499   : > { %2326 = vst [vmem:[%s3521_s18 + $0x1f8] sm:$0xff] %v2262_v63 }
 0x49a   : > { %2952 = shalt.err (!%p2949_p2)
}
 0x49b   : > { %s2953_s25 = scalar_lea.hbm %s3649_s22, 8192  ;;  %s2957_s26 = scalar_lea.hbm %s3701_s3, 16384 }
 0x49c   : > { %p2954_p13 = scmp.ne.s32.totalorder %s3649_s22, %s2953_s25  ;;  %p2958_p4 = scmp.lt.u32.totalorder %s3649_s22, %s3701_s3 }
 0x49d   : > { %p2959_p7 = scmp.lt.u32.totalorder %s2957_s26, %s2953_s25  ;;  %p2961_p11 = scmp.lt.u32.totalorder %s2953_s25, %s3649_s22 }
 0x49e   : > { %p2955_p6 = pnand %p2954_p13, %p3715_p0 }
 0x49f   : > { %p2960_p8 = por %p2959_p7, %p2958_p4 }
 0x4a0   : > { %p2956_p10 = pneg %p2955_p6 }
 0x4a1   : > { %p2962_p1 = por %p2961_p11, %p2960_p8 }
 0x4a3   : > { %p2963_p3 = pnand %p2962_p1, %p2956_p10 }
 0x4a5   : > { %2966 = shalt.err (!%p2963_p3)
}
 0x4a6   : > { %s3021_s5 = smov 256   ;;  %s3022_s18 = smov 16  }
 0x4a7   : > { %2596 = dma.vmem_to_hbm [thread:$0]  (%p3715_p0), %s3651_s24, 8192, %s3649_s22, %s2328_s16, %s3021_s5, %s3021_s5, %s3022_s18  }
 0x4a8 PF: > { %s2357_s20 = sand.u32 1, %s2997_s12   ;;  %p3716_p5 = scmp.ne.s32.totalorder %s3706_s19, 0 }
 0x4a9   : > { %p3717_p9 = scmp.ge.s32.totalorder %s3009_s15, 2  ;;  %s2358_s27 = scalar_lea.sflag [#allocation4], %s2357_s20 }
 0x4ab   : > { %p2610_p12 = pnand %p3717_p9, %p3716_p5 }
 0x4ad   : > { %2992 = dma.done.wait (!%p2610_p12), %s2358_s27, 8192  }
 0x4ae   : > { %2994 = vsyncadd (!%p2610_p12), %s2358_s27, 4294959104  ;;  %p17_p2 = scmp.ge.s32.totalorder %s3153_s6, 4   ;;  %s3718_s12 = smov %s3001_s13 }
 0x4af   : > { %s3719_s13 = smov %s3005_s14  ;;  %s3720_s14 = smov %s3162_s9 }
 0x4b0   : > { %s3721_s15 = smov %s3153_s6  ;;  %19 = sbr.rel (!%p17_p2) target bundleno = 6 (0x6), region = 91 }
 0x4b7   :  { %2363 = vsyncpa [#allocation3], 1 }
 0x4b8   :  { %2365 = vsyncpa [#allocation3 + $0x1], 1 }
 0x4b9   :  { %2366 = vsyncpa [#allocation6], 1 }
 0x4ba   :  { %2367 = vsyncpa [#allocation4], 1 }
 0x4bb   :  { %2369 = vsyncpa [#allocation4 + $0x1], 1 }

</bundles_post_ra>
